<compile_context>
chip_gen: v7x
topology: tpu7x:2x2x1
jax: 0.10.0
libtpu: 0.0.40
codegen_flags: <defaults>
</compile_context>

<pallas_src>
import functools

import jax
import jax.numpy as jnp
from jax import lax
from jax.experimental import pallas as pl
from jax.experimental.pallas import tpu as pltpu

_LN_EPS = 1e-5                 # nn.LayerNorm default eps (norm_layer=nn.LayerNorm)
_MM_DTYPE = jnp.bfloat16       # MXU operand dtype; accumulation is always f32
_VMEM_LIMIT = 32 * 1024 * 1024 # safe on v5e/v6e/v7x


# ----------------------------- small helpers ------------------------------

def _mm(a, b):
    """MXU matmul: bf16 operands, f32 accumulation."""
    return jnp.dot(a.astype(_MM_DTYPE), b.astype(_MM_DTYPE),
                   preferred_element_type=jnp.float32)


def _gelu_tanh(x):
    # PyTorch nn.GELU(approximate="tanh") — PixArtAlphaTextProjection act_fn.
    c = jnp.float32(0.7978845608028654)  # sqrt(2/pi)
    return 0.5 * x * (1.0 + jnp.tanh(c * (x + 0.044715 * x * x * x)))


def _gelu_exact(x):
    # PyTorch nn.GELU() exact (erf) — timm Mlp activation.
    return 0.5 * x * (1.0 + lax.erf(x * jnp.float32(0.7071067811865476)))


def _layernorm_f32(x, gamma, beta, eps=_LN_EPS):
    mean = jnp.mean(x, axis=-1, keepdims=True)
    xc = x - mean
    var = jnp.mean(xc * xc, axis=-1, keepdims=True)
    return xc * lax.rsqrt(var + jnp.float32(eps)) * gamma + beta


def _pick_row_tile(m):
    for t in (256, 128, 64, 32, 16, 8):
        if m % t == 0:
            return t
    return m


def _cparams():
    return pltpu.CompilerParams(dimension_semantics=("parallel",),
                                vmem_limit_bytes=_VMEM_LIMIT)


# ----------------------------- kernels -----------------------------------

def text_proj_kernel(x_ref, w1_ref, b1_ref, w2_ref, b2_ref, o_ref):
    # PixArtAlphaTextProjection: linear_1 -> GELU(tanh) -> linear_2 (fused).
    x = x_ref[...].astype(jnp.float32)                                   # (tm, Cin)
    h = _mm(x, w1_ref[...]) + b1_ref[...].astype(jnp.float32)            # (tm, D)
    h = _gelu_tanh(h)
    h = _mm(h, w2_ref[...]) + b2_ref[...].astype(jnp.float32)            # (tm, D)
    o_ref[...] = h.astype(o_ref.dtype)


def block_attn_kernel(h_ref, g_ref, b_ref, wqkv_ref, bqkv_ref, wo_ref, bo_ref,
                      o_ref, *, num_heads):
    # Fused:  LN1 -> qkv -> MHSA (all heads batched) -> out-proj -> +residual.
    h = h_ref[0].astype(jnp.float32)                                     # (S, D)
    S, D = h.shape
    hd = D // num_heads
    scale = jnp.float32(float(hd) ** -0.5)

    xn = _layernorm_f32(h, g_ref[...].astype(jnp.float32),
                        b_ref[...].astype(jnp.float32))

    qkv = _mm(xn, wqkv_ref[...]) + bqkv_ref[...].astype(jnp.float32)     # (S, 3D)
    # timm qkv layout along last dim: [q(D) | k(D) | v(D)], each split into heads.
    q = qkv[:, 0 * D:1 * D].reshape(S, num_heads, hd).transpose(1, 0, 2)  # (H, S, hd)
    k = qkv[:, 1 * D:2 * D].reshape(S, num_heads, hd).transpose(1, 0, 2)  # (H, S, hd)
    v = qkv[:, 2 * D:3 * D].reshape(S, num_heads, hd).transpose(1, 0, 2)  # (H, S, hd)

    # One batched MXU contraction over all heads.
    s = jnp.einsum("hqd,hkd->hqk", q.astype(_MM_DTYPE), k.astype(_MM_DTYPE),
                   preferred_element_type=jnp.float32) * scale            # (H, S, S)
    s = s - jnp.max(s, axis=-1, keepdims=True)
    p = jnp.exp(s)
    p = p * pl.reciprocal(jnp.sum(p, axis=-1, keepdims=True), approx=True)

    ctx = jnp.einsum("hqk,hkd->hqd", p.astype(_MM_DTYPE), v.astype(_MM_DTYPE),
                     preferred_element_type=jnp.float32)                  # (H, S, hd)
    ctx = ctx.transpose(1, 0, 2).reshape(S, D)                            # (S, D)

    out = _mm(ctx, wo_ref[...]) + bo_ref[...].astype(jnp.float32)
    o_ref[0] = (h + out).astype(o_ref.dtype)                              # fused residual


def block_mlp_kernel(h_ref, g_ref, b_ref, w1_ref, b1_ref, w2_ref, b2_ref, o_ref):
    # Fused:  LN2 -> fc1 -> GELU(erf) -> fc2 -> +residual.
    h = h_ref[...].astype(jnp.float32)                                    # (tm, D)
    xn = _layernorm_f32(h, g_ref[...].astype(jnp.float32),
                        b_ref[...].astype(jnp.float32))
    m = _mm(xn, w1_ref[...]) + b1_ref[...].astype(jnp.float32)            # (tm, Hm)
    m = _gelu_exact(m)
    m = _mm(m, w2_ref[...]) + b2_ref[...].astype(jnp.float32)             # (tm, D)
    o_ref[...] = (h + m).astype(o_ref.dtype)                              # fused residual


def layernorm_kernel(x_ref, g_ref, b_ref, o_ref):
    x = x_ref[...].astype(jnp.float32)
    y = _layernorm_f32(x, g_ref[...].astype(jnp.float32),
                       b_ref[...].astype(jnp.float32))
    o_ref[...] = y.astype(o_ref.dtype)


# ----------------------------- pallas wrappers ----------------------------
# TODO(synk): for production D (>=1024) the full (D, 4D) MLP / (Cin, D) proj weights
# should additionally be K/N-tiled with an f32 accumulator scratch to stay under
# v7x's 64 MiB VMEM; at the shapes exercised here the fused whole-weight blocks fit.

def text_proj_pallas(x2d, w1, b1, w2, b2):
    M, Cin = x2d.shape
    D = w1.shape[1]
    tm = _pick_row_tile(M)
    flops = 2 * M * Cin * D + 2 * M * D * D
    bytes_acc = 4 * (M * Cin + Cin * D + D * D + 2 * D + M * D)
    return pl.pallas_call(
        text_proj_kernel,
        out_shape=jax.ShapeDtypeStruct((M, D), x2d.dtype),
        grid=(M // tm,),
        in_specs=[pl.BlockSpec((tm, Cin), lambda i: (i, 0)),
                  pl.BlockSpec((Cin, D), lambda i: (0, 0)),
                  pl.BlockSpec((1, D), lambda i: (0, 0)),
                  pl.BlockSpec((D, D), lambda i: (0, 0)),
                  pl.BlockSpec((1, D), lambda i: (0, 0))],
        out_specs=pl.BlockSpec((tm, D), lambda i: (i, 0)),
        compiler_params=_cparams(),
        cost_estimate=pl.CostEstimate(flops=flops, transcendentals=M * D,
                                      bytes_accessed=bytes_acc),
    )(x2d, w1, b1.reshape(1, D), w2, b2.reshape(1, D))


def block_attn_pallas(h, ln_g, ln_b, wqkv, bqkv, wo, bo, num_heads):
    B, S, D = h.shape
    flops = B * (2 * S * D * 3 * D + 4 * S * S * D + 2 * S * D * D)
    bytes_acc = 4 * (2 * B * S * D + D * 3 * D + 3 * D + D * D + 3 * D)
    return pl.pallas_call(
        functools.partial(block_attn_kernel, num_heads=num_heads),
        out_shape=jax.ShapeDtypeStruct((B, S, D), h.dtype),
        grid=(B,),
        in_specs=[pl.BlockSpec((1, S, D), lambda b: (b, 0, 0)),
                  pl.BlockSpec((1, D), lambda b: (0, 0)),
                  pl.BlockSpec((1, D), lambda b: (0, 0)),
                  pl.BlockSpec((D, 3 * D), lambda b: (0, 0)),
                  pl.BlockSpec((1, 3 * D), lambda b: (0, 0)),
                  pl.BlockSpec((D, D), lambda b: (0, 0)),
                  pl.BlockSpec((1, D), lambda b: (0, 0))],
        out_specs=pl.BlockSpec((1, S, D), lambda b: (b, 0, 0)),
        compiler_params=_cparams(),
        cost_estimate=pl.CostEstimate(flops=flops,
                                      transcendentals=B * num_heads * S * S,
                                      bytes_accessed=bytes_acc),
    )(h, ln_g.reshape(1, D), ln_b.reshape(1, D),
      wqkv, bqkv.reshape(1, 3 * D), wo, bo.reshape(1, D))


def block_mlp_pallas(h2d, ln_g, ln_b, w1, b1, w2, b2):
    M, D = h2d.shape
    Hm = w1.shape[1]
    tm = _pick_row_tile(M)
    flops = 4 * M * D * Hm
    bytes_acc = 4 * (2 * M * D + D * Hm + Hm + Hm * D + 3 * D)
    return pl.pallas_call(
        block_mlp_kernel,
        out_shape=jax.ShapeDtypeStruct((M, D), h2d.dtype),
        grid=(M // tm,),
        in_specs=[pl.BlockSpec((tm, D), lambda i: (i, 0)),
                  pl.BlockSpec((1, D), lambda i: (0, 0)),
                  pl.BlockSpec((1, D), lambda i: (0, 0)),
                  pl.BlockSpec((D, Hm), lambda i: (0, 0)),
                  pl.BlockSpec((1, Hm), lambda i: (0, 0)),
                  pl.BlockSpec((Hm, D), lambda i: (0, 0)),
                  pl.BlockSpec((1, D), lambda i: (0, 0))],
        out_specs=pl.BlockSpec((tm, D), lambda i: (i, 0)),
        compiler_params=_cparams(),
        cost_estimate=pl.CostEstimate(flops=flops, transcendentals=M * Hm,
                                      bytes_accessed=bytes_acc),
    )(h2d, ln_g.reshape(1, D), ln_b.reshape(1, D),
      w1, b1.reshape(1, Hm), w2, b2.reshape(1, D))


def layernorm_pallas(x2d, gamma, beta):
    M, D = x2d.shape
    tm = _pick_row_tile(M)
    return pl.pallas_call(
        layernorm_kernel,
        out_shape=jax.ShapeDtypeStruct((M, D), x2d.dtype),
        grid=(M // tm,),
        in_specs=[pl.BlockSpec((tm, D), lambda i: (i, 0)),
                  pl.BlockSpec((1, D), lambda i: (0, 0)),
                  pl.BlockSpec((1, D), lambda i: (0, 0))],
        out_specs=pl.BlockSpec((tm, D), lambda i: (i, 0)),
        compiler_params=_cparams(),
    )(x2d, gamma.reshape(1, D), beta.reshape(1, D))


# ----------------------------- model --------------------------------------

def init_params(key, caption_channels, embed_dim, depth, mlp_ratio=4.0):
    mlp_hidden = int(embed_dim * mlp_ratio)

    def dense(k, fan_in, fan_out):
        return (0.02 * jax.random.normal(k, (fan_in, fan_out), jnp.float32),
                jnp.zeros((fan_out,), jnp.float32))

    keys = jax.random.split(key, 2 + depth)
    p = {}
    # PixArtAlphaTextProjection: linear_1 -> GELU(tanh) -> linear_2
    p["proj_w1"], p["proj_b1"] = dense(keys[0], caption_channels, embed_dim)
    p["proj_w2"], p["proj_b2"] = dense(keys[1], embed_dim, embed_dim)

    blocks = []
    for d in range(depth):
        bk = jax.random.split(keys[2 + d], 4)
        blk = {
            "ln1_g": jnp.ones((embed_dim,), jnp.float32),
            "ln1_b": jnp.zeros((embed_dim,), jnp.float32),
            "ln2_g": jnp.ones((embed_dim,), jnp.float32),
            "ln2_b": jnp.zeros((embed_dim,), jnp.float32),
        }
        blk["wqkv"], blk["bqkv"] = dense(bk[0], embed_dim, 3 * embed_dim)
        blk["wo"], blk["bo"] = dense(bk[1], embed_dim, embed_dim)
        blk["fc1_w"], blk["fc1_b"] = dense(bk[2], embed_dim, mlp_hidden)
        blk["fc2_w"], blk["fc2_b"] = dense(bk[3], mlp_hidden, embed_dim)
        blocks.append(blk)
    p["blocks"] = blocks

    p["lnf_g"] = jnp.ones((embed_dim,), jnp.float32)
    p["lnf_b"] = jnp.zeros((embed_dim,), jnp.float32)
    return p


def text_embedding_forward(params, x, num_heads):
    B, S, Cin = x.shape

    # text_proj (fused linear -> GELU(tanh) -> linear)
    h2d = text_proj_pallas(x.reshape(B * S, Cin),
                           params["proj_w1"], params["proj_b1"],
                           params["proj_w2"], params["proj_b2"])
    D = h2d.shape[-1]
    h = h2d.reshape(B, S, D)

    # text_aligner: stack of pre-norm Blocks, two fused pallas_calls per block.
    for blk in params["blocks"]:
        h = block_attn_pallas(h, blk["ln1_g"], blk["ln1_b"],
                              blk["wqkv"], blk["bqkv"], blk["wo"], blk["bo"],
                              num_heads)
        h = block_mlp_pallas(h.reshape(B * S, D), blk["ln2_g"], blk["ln2_b"],
                             blk["fc1_w"], blk["fc1_b"],
                             blk["fc2_w"], blk["fc2_b"]).reshape(B, S, D)

    # text_aligner_norm
    h = layernorm_pallas(h.reshape(B * S, D),
                         params["lnf_g"], params["lnf_b"]).reshape(B, S, D)
    return h


# ----------------------------- main ----------------------------------------

if __name__ == "__main__":
    caption_channels = 32
    encoder_embed_dim = 32
    text_num_heads = 4
    text_depth = 2
    B, S = 2, 8

    key = jax.random.PRNGKey(0)
    k_params, k_x = jax.random.split(key)

    params = init_params(k_params, caption_channels, encoder_embed_dim, text_depth)
    x = jax.random.normal(k_x, (B, S, caption_channels), jnp.float32)

    fwd = jax.jit(functools.partial(text_embedding_forward, num_heads=text_num_heads))
    out = fwd(params, x)
    out = jax.block_until_ready(out)

    assert out.shape == (B, S, encoder_embed_dim)
    assert bool(jnp.all(jnp.isfinite(out)))
    print("KERNEL_OK")
</pallas_src>

<mosaic_0001>
module attributes {stable_mosaic.version = 11 : i64} {
  func.func @block_mlp_kernel(%arg0: i32, %arg1: memref<16x32xf32, #tpu.memory_space<vmem>>, %arg2: memref<1x32xf32, #tpu.memory_space<vmem>>, %arg3: memref<1x32xf32, #tpu.memory_space<vmem>>, %arg4: memref<32x128xf32, #tpu.memory_space<vmem>>, %arg5: memref<1x128xf32, #tpu.memory_space<vmem>>, %arg6: memref<128x32xf32, #tpu.memory_space<vmem>>, %arg7: memref<1x32xf32, #tpu.memory_space<vmem>>, %arg8: memref<16x32xf32, #tpu.memory_space<vmem>>) attributes {dimension_semantics = [#tpu.dimension_semantics<parallel>], iteration_bounds = array<i64: 1>, scalar_prefetch = 0 : i64, scratch_operands = 0 : i64, tpu.core_type = #tpu.core_type<tc>, window_params = [{transform_indices = @transform_0, window_bounds = array<i64: 16, 32>}, {pipeline_mode = #tpu.pipeline_mode<synchronous>, transform_indices = @transform_1, window_bounds = array<i64: 1, 32>}, {pipeline_mode = #tpu.pipeline_mode<synchronous>, transform_indices = @transform_2, window_bounds = array<i64: 1, 32>}, {pipeline_mode = #tpu.pipeline_mode<synchronous>, transform_indices = @transform_3, window_bounds = array<i64: 32, 128>}, {pipeline_mode = #tpu.pipeline_mode<synchronous>, transform_indices = @transform_4, window_bounds = array<i64: 1, 128>}, {pipeline_mode = #tpu.pipeline_mode<synchronous>, transform_indices = @transform_5, window_bounds = array<i64: 128, 32>}, {pipeline_mode = #tpu.pipeline_mode<synchronous>, transform_indices = @transform_6, window_bounds = array<i64: 1, 32>}, {transform_indices = @transform_7, window_bounds = array<i64: 16, 32>}]} {
    %c0 = arith.constant 0 : index
    %c0_0 = arith.constant 0 : index
    %0 = vector.load %arg1[%c0, %c0_0] : memref<16x32xf32, #tpu.memory_space<vmem>>, vector<16x32xf32>
    %c0_1 = arith.constant 0 : index
    %c0_2 = arith.constant 0 : index
    %1 = vector.load %arg2[%c0_1, %c0_2] : memref<1x32xf32, #tpu.memory_space<vmem>>, vector<1x32xf32>
    %c0_3 = arith.constant 0 : index
    %c0_4 = arith.constant 0 : index
    %2 = vector.load %arg3[%c0_3, %c0_4] : memref<1x32xf32, #tpu.memory_space<vmem>>, vector<1x32xf32>
    %cst = arith.constant dense<0.000000e+00> : vector<16xf32>
    %3 = vector.multi_reduction <add>, %0, %cst [1] : vector<16x32xf32> to vector<16xf32>
    %4 = vector.shape_cast %3 : vector<16xf32> to vector<16x1xf32>
    %cst_5 = arith.constant 3.200000e+01 : f32
    %5 = vector.broadcast %cst_5 : f32 to vector<16x1xf32>
    %6 = arith.divf %4, %5 : vector<16x1xf32>
    %7 = vector.broadcast %6 : vector<16x1xf32> to vector<16x32xf32>
    %8 = arith.subf %0, %7 : vector<16x32xf32>
    %9 = arith.mulf %8, %8 : vector<16x32xf32>
    %cst_6 = arith.constant dense<0.000000e+00> : vector<16xf32>
    %10 = vector.multi_reduction <add>, %9, %cst_6 [1] : vector<16x32xf32> to vector<16xf32>
    %11 = vector.shape_cast %10 : vector<16xf32> to vector<16x1xf32>
    %cst_7 = arith.constant 3.200000e+01 : f32
    %12 = vector.broadcast %cst_7 : f32 to vector<16x1xf32>
    %13 = arith.divf %11, %12 : vector<16x1xf32>
    %cst_8 = arith.constant 9.99999974E-6 : f32
    %14 = vector.broadcast %cst_8 : f32 to vector<16x1xf32>
    %15 = arith.addf %13, %14 : vector<16x1xf32>
    %16 = math.rsqrt %15 : vector<16x1xf32>
    %17 = vector.broadcast %16 : vector<16x1xf32> to vector<16x32xf32>
    %18 = arith.mulf %8, %17 : vector<16x32xf32>
    %19 = vector.broadcast %1 : vector<1x32xf32> to vector<16x32xf32>
    %20 = arith.mulf %18, %19 : vector<16x32xf32>
    %21 = vector.broadcast %2 : vector<1x32xf32> to vector<16x32xf32>
    %22 = arith.addf %20, %21 : vector<16x32xf32>
    %c0_9 = arith.constant 0 : index
    %c0_10 = arith.constant 0 : index
    %23 = vector.load %arg4[%c0_9, %c0_10] : memref<32x128xf32, #tpu.memory_space<vmem>>, vector<32x128xf32>
    %24 = arith.truncf %22 : vector<16x32xf32> to vector<16x32xbf16>
    %25 = arith.truncf %23 : vector<32x128xf32> to vector<32x128xbf16>
    %cst_11 = arith.constant dense<0.000000e+00> : vector<16x128xf32>
    %26 = tpu.matmul %24, %25, %cst_11 {dimension_numbers = #tpu.dot_dimension_numbers<[1], [0], [0], [1], [0, 0, 1, 1], [], []>} : vector<16x32xbf16>, vector<32x128xbf16>, vector<16x128xf32> -> vector<16x128xf32>
    %c0_12 = arith.constant 0 : index
    %c0_13 = arith.constant 0 : index
    %27 = vector.load %arg5[%c0_12, %c0_13] : memref<1x128xf32, #tpu.memory_space<vmem>>, vector<1x128xf32>
    %28 = vector.broadcast %27 : vector<1x128xf32> to vector<16x128xf32>
    %29 = arith.addf %26, %28 : vector<16x128xf32>
    %cst_14 = arith.constant 5.000000e-01 : f32
    %30 = vector.broadcast %cst_14 : f32 to vector<16x128xf32>
    %31 = arith.mulf %30, %29 : vector<16x128xf32>
    %cst_15 = arith.constant 0.707106769 : f32
    %32 = vector.broadcast %cst_15 : f32 to vector<16x128xf32>
    %33 = arith.mulf %29, %32 : vector<16x128xf32>
    %34 = math.erf %33 : vector<16x128xf32>
    %cst_16 = arith.constant 1.000000e+00 : f32
    %35 = vector.broadcast %cst_16 : f32 to vector<16x128xf32>
    %36 = arith.addf %35, %34 : vector<16x128xf32>
    %37 = arith.mulf %31, %36 : vector<16x128xf32>
    %c0_17 = arith.constant 0 : index
    %c0_18 = arith.constant 0 : index
    %38 = vector.load %arg6[%c0_17, %c0_18] : memref<128x32xf32, #tpu.memory_space<vmem>>, vector<128x32xf32>
    %39 = arith.truncf %37 : vector<16x128xf32> to vector<16x128xbf16>
    %40 = arith.truncf %38 : vector<128x32xf32> to vector<128x32xbf16>
    %cst_19 = arith.constant dense<0.000000e+00> : vector<16x32xf32>
    %41 = tpu.matmul %39, %40, %cst_19 {dimension_numbers = #tpu.dot_dimension_numbers<[1], [0], [0], [1], [0, 0, 1, 1], [], []>} : vector<16x128xbf16>, vector<128x32xbf16>, vector<16x32xf32> -> vector<16x32xf32>
    %c0_20 = arith.constant 0 : index
    %c0_21 = arith.constant 0 : index
    %42 = vector.load %arg7[%c0_20, %c0_21] : memref<1x32xf32, #tpu.memory_space<vmem>>, vector<1x32xf32>
    %43 = vector.broadcast %42 : vector<1x32xf32> to vector<16x32xf32>
    %44 = arith.addf %41, %43 : vector<16x32xf32>
    %45 = arith.addf %0, %44 : vector<16x32xf32>
    %c0_22 = arith.constant 0 : index
    %c0_23 = arith.constant 0 : index
    %46 = vector.load %arg8[%c0_22, %c0_23] : memref<16x32xf32, #tpu.memory_space<vmem>>, vector<16x32xf32>
    tpu.vector_store %arg8[%c0_22, %c0_23], %45 {strides = array<i32>} : memref<16x32xf32, #tpu.memory_space<vmem>>, vector<16x32xf32>,
    return
  }
  func.func @transform_0(%arg0: i32) -> (i32, i32) {
    %c0_i32 = arith.constant 0 : i32
    %c0_i32_0 = arith.constant 0 : i32
    return %arg0, %c0_i32 : i32, i32
  }
  func.func @transform_1(%arg0: i32) -> (i32, i32) {
    %c0_i32 = arith.constant 0 : i32
    %c0_i32_0 = arith.constant 0 : i32
    %c0_i32_1 = arith.constant 0 : i32
    return %c0_i32, %c0_i32_0 : i32, i32
  }
  func.func @transform_2(%arg0: i32) -> (i32, i32) {
    %c0_i32 = arith.constant 0 : i32
    %c0_i32_0 = arith.constant 0 : i32
    %c0_i32_1 = arith.constant 0 : i32
    return %c0_i32, %c0_i32_0 : i32, i32
  }
  func.func @transform_3(%arg0: i32) -> (i32, i32) {
    %c0_i32 = arith.constant 0 : i32
    %c0_i32_0 = arith.constant 0 : i32
    %c0_i32_1 = arith.constant 0 : i32
    return %c0_i32, %c0_i32_0 : i32, i32
  }
  func.func @transform_4(%arg0: i32) -> (i32, i32) {
    %c0_i32 = arith.constant 0 : i32
    %c0_i32_0 = arith.constant 0 : i32
    %c0_i32_1 = arith.constant 0 : i32
    return %c0_i32, %c0_i32_0 : i32, i32
  }
  func.func @transform_5(%arg0: i32) -> (i32, i32) {
    %c0_i32 = arith.constant 0 : i32
    %c0_i32_0 = arith.constant 0 : i32
    %c0_i32_1 = arith.constant 0 : i32
    return %c0_i32, %c0_i32_0 : i32, i32
  }
  func.func @transform_6(%arg0: i32) -> (i32, i32) {
    %c0_i32 = arith.constant 0 : i32
    %c0_i32_0 = arith.constant 0 : i32
    %c0_i32_1 = arith.constant 0 : i32
    return %c0_i32, %c0_i32_0 : i32, i32
  }
  func.func @transform_7(%arg0: i32) -> (i32, i32) {
    %c0_i32 = arith.constant 0 : i32
    %c0_i32_0 = arith.constant 0 : i32
    return %arg0, %c0_i32 : i32, i32
  }
}

module attributes {stable_mosaic.version = 11 : i64} {
  func.func @block_attn_kernel(%arg0: i32, %arg1: memref<1x8x32xf32, #tpu.memory_space<vmem>>, %arg2: memref<1x32xf32, #tpu.memory_space<vmem>>, %arg3: memref<1x32xf32, #tpu.memory_space<vmem>>, %arg4: memref<32x96xf32, #tpu.memory_space<vmem>>, %arg5: memref<1x96xf32, #tpu.memory_space<vmem>>, %arg6: memref<32x32xf32, #tpu.memory_space<vmem>>, %arg7: memref<1x32xf32, #tpu.memory_space<vmem>>, %arg8: memref<1x8x32xf32, #tpu.memory_space<vmem>>) attributes {dimension_semantics = [#tpu.dimension_semantics<parallel>], iteration_bounds = array<i64: 2>, scalar_prefetch = 0 : i64, scratch_operands = 0 : i64, tpu.core_type = #tpu.core_type<tc>, window_params = [{transform_indices = @transform_0, window_bounds = array<i64: 1, 8, 32>}, {pipeline_mode = #tpu.pipeline_mode<synchronous>, transform_indices = @transform_1, window_bounds = array<i64: 1, 32>}, {pipeline_mode = #tpu.pipeline_mode<synchronous>, transform_indices = @transform_2, window_bounds = array<i64: 1, 32>}, {pipeline_mode = #tpu.pipeline_mode<synchronous>, transform_indices = @transform_3, window_bounds = array<i64: 32, 96>}, {pipeline_mode = #tpu.pipeline_mode<synchronous>, transform_indices = @transform_4, window_bounds = array<i64: 1, 96>}, {pipeline_mode = #tpu.pipeline_mode<synchronous>, transform_indices = @transform_5, window_bounds = array<i64: 32, 32>}, {pipeline_mode = #tpu.pipeline_mode<synchronous>, transform_indices = @transform_6, window_bounds = array<i64: 1, 32>}, {transform_indices = @transform_7, window_bounds = array<i64: 1, 8, 32>}]} {
    %c0 = arith.constant 0 : index
    %c0_0 = arith.constant 0 : index
    %c0_1 = arith.constant 0 : index
    %0 = vector.load %arg1[%c0, %c0_0, %c0_1] : memref<1x8x32xf32, #tpu.memory_space<vmem>>, vector<1x8x32xf32>
    %1 = vector.shape_cast %0 : vector<1x8x32xf32> to vector<8x32xf32>
    %c0_2 = arith.constant 0 : index
    %c0_3 = arith.constant 0 : index
    %2 = vector.load %arg2[%c0_2, %c0_3] : memref<1x32xf32, #tpu.memory_space<vmem>>, vector<1x32xf32>
    %c0_4 = arith.constant 0 : index
    %c0_5 = arith.constant 0 : index
    %3 = vector.load %arg3[%c0_4, %c0_5] : memref<1x32xf32, #tpu.memory_space<vmem>>, vector<1x32xf32>
    %cst = arith.constant dense<0.000000e+00> : vector<8xf32>
    %4 = vector.multi_reduction <add>, %1, %cst [1] : vector<8x32xf32> to vector<8xf32>
    %5 = vector.shape_cast %4 : vector<8xf32> to vector<8x1xf32>
    %cst_6 = arith.constant 3.200000e+01 : f32
    %6 = vector.broadcast %cst_6 : f32 to vector<8x1xf32>
    %7 = arith.divf %5, %6 : vector<8x1xf32>
    %8 = vector.broadcast %7 : vector<8x1xf32> to vector<8x32xf32>
    %9 = arith.subf %1, %8 : vector<8x32xf32>
    %10 = arith.mulf %9, %9 : vector<8x32xf32>
    %cst_7 = arith.constant dense<0.000000e+00> : vector<8xf32>
    %11 = vector.multi_reduction <add>, %10, %cst_7 [1] : vector<8x32xf32> to vector<8xf32>
    %12 = vector.shape_cast %11 : vector<8xf32> to vector<8x1xf32>
    %cst_8 = arith.constant 3.200000e+01 : f32
    %13 = vector.broadcast %cst_8 : f32 to vector<8x1xf32>
    %14 = arith.divf %12, %13 : vector<8x1xf32>
    %cst_9 = arith.constant 9.99999974E-6 : f32
    %15 = vector.broadcast %cst_9 : f32 to vector<8x1xf32>
    %16 = arith.addf %14, %15 : vector<8x1xf32>
    %17 = math.rsqrt %16 : vector<8x1xf32>
    %18 = vector.broadcast %17 : vector<8x1xf32> to vector<8x32xf32>
    %19 = arith.mulf %9, %18 : vector<8x32xf32>
    %20 = vector.broadcast %2 : vector<1x32xf32> to vector<8x32xf32>
    %21 = arith.mulf %19, %20 : vector<8x32xf32>
    %22 = vector.broadcast %3 : vector<1x32xf32> to vector<8x32xf32>
    %23 = arith.addf %21, %22 : vector<8x32xf32>
    %c0_10 = arith.constant 0 : index
    %c0_11 = arith.constant 0 : index
    %24 = vector.load %arg4[%c0_10, %c0_11] : memref<32x96xf32, #tpu.memory_space<vmem>>, vector<32x96xf32>
    %25 = arith.truncf %23 : vector<8x32xf32> to vector<8x32xbf16>
    %26 = arith.truncf %24 : vector<32x96xf32> to vector<32x96xbf16>
    %cst_12 = arith.constant dense<0.000000e+00> : vector<8x96xf32>
    %27 = tpu.matmul %25, %26, %cst_12 {dimension_numbers = #tpu.dot_dimension_numbers<[1], [0], [0], [1], [0, 0, 1, 1], [], []>} : vector<8x32xbf16>, vector<32x96xbf16>, vector<8x96xf32> -> vector<8x96xf32>
    %c0_13 = arith.constant 0 : index
    %c0_14 = arith.constant 0 : index
    %28 = vector.load %arg5[%c0_13, %c0_14] : memref<1x96xf32, #tpu.memory_space<vmem>>, vector<1x96xf32>
    %29 = vector.broadcast %28 : vector<1x96xf32> to vector<8x96xf32>
    %30 = arith.addf %27, %29 : vector<8x96xf32>
    %31 = vector.extract_strided_slice %30 {offsets = [0, 0], sizes = [8, 32], strides = [1, 1]} : vector<8x96xf32> to vector<8x32xf32>
    %32 = vector.shape_cast %31 : vector<8x32xf32> to vector<8x4x8xf32>
    %33 = tpu.transpose %32, [1, 0, 2] : vector<8x4x8xf32> -> vector<4x8x8xf32>
    %34 = vector.extract_strided_slice %30 {offsets = [0, 32], sizes = [8, 32], strides = [1, 1]} : vector<8x96xf32> to vector<8x32xf32>
    %35 = vector.shape_cast %34 : vector<8x32xf32> to vector<8x4x8xf32>
    %36 = tpu.transpose %35, [1, 0, 2] : vector<8x4x8xf32> -> vector<4x8x8xf32>
    %37 = vector.extract_strided_slice %30 {offsets = [0, 64], sizes = [8, 32], strides = [1, 1]} : vector<8x96xf32> to vector<8x32xf32>
    %38 = vector.shape_cast %37 : vector<8x32xf32> to vector<8x4x8xf32>
    %39 = tpu.transpose %38, [1, 0, 2] : vector<8x4x8xf32> -> vector<4x8x8xf32>
    %40 = arith.truncf %33 : vector<4x8x8xf32> to vector<4x8x8xbf16>
    %41 = arith.truncf %36 : vector<4x8x8xf32> to vector<4x8x8xbf16>
    "tpu.trace_start"() <{level = 10 : i32, message = "hqd,hkd->hqk"}> : () -> ()
    %cst_15 = arith.constant dense<0.000000e+00> : vector<4x8x8xf32>
    %42 = tpu.matmul %40, %41, %cst_15 {dimension_numbers = #tpu.dot_dimension_numbers<[2], [2], [1], [1], [0, 0, 0, 1, 1, 1], [0], [0]>} : vector<4x8x8xbf16>, vector<4x8x8xbf16>, vector<4x8x8xf32> -> vector<4x8x8xf32>
    "tpu.trace_stop"() : () -> ()
    %cst_16 = arith.constant 0.353553385 : f32
    %43 = vector.broadcast %cst_16 : f32 to vector<4x8x8xf32>
    %44 = arith.mulf %42, %43 : vector<4x8x8xf32>
    %cst_17 = arith.constant dense<0xFF800000> : vector<4x8xf32>
    %45 = vector.multi_reduction <maximumf>, %44, %cst_17 [2] : vector<4x8x8xf32> to vector<4x8xf32>
    %46 = vector.shape_cast %45 : vector<4x8xf32> to vector<4x8x1xf32>
    %47 = vector.broadcast %46 : vector<4x8x1xf32> to vector<4x8x8xf32>
    %48 = arith.subf %44, %47 : vector<4x8x8xf32>
    %49 = math.exp %48 : vector<4x8x8xf32>
    %cst_18 = arith.constant dense<0.000000e+00> : vector<4x8xf32>
    %50 = vector.multi_reduction <add>, %49, %cst_18 [2] : vector<4x8x8xf32> to vector<4x8xf32>
    %51 = vector.shape_cast %50 : vector<4x8xf32> to vector<4x8x1xf32>
    %52 = tpu.reciprocal %51 {approx = true} : vector<4x8x1xf32> -> vector<4x8x1xf32>
    %53 = vector.broadcast %52 : vector<4x8x1xf32> to vector<4x8x8xf32>
    %54 = arith.mulf %49, %53 : vector<4x8x8xf32>
    %55 = arith.truncf %54 : vector<4x8x8xf32> to vector<4x8x8xbf16>
    %56 = arith.truncf %39 : vector<4x8x8xf32> to vector<4x8x8xbf16>
    "tpu.trace_start"() <{level = 10 : i32, message = "hqk,hkd->hqd"}> : () -> ()
    %cst_19 = arith.constant dense<0.000000e+00> : vector<4x8x8xf32>
    %57 = tpu.matmul %55, %56, %cst_19 {dimension_numbers = #tpu.dot_dimension_numbers<[2], [1], [1], [2], [0, 0, 0, 1, 1, 2], [0], [0]>} : vector<4x8x8xbf16>, vector<4x8x8xbf16>, vector<4x8x8xf32> -> vector<4x8x8xf32>
    "tpu.trace_stop"() : () -> ()
    %58 = tpu.transpose %57, [1, 0, 2] : vector<4x8x8xf32> -> vector<8x4x8xf32>
    %59 = vector.shape_cast %58 : vector<8x4x8xf32> to vector<8x32xf32>
    %c0_20 = arith.constant 0 : index
    %c0_21 = arith.constant 0 : index
    %60 = vector.load %arg6[%c0_20, %c0_21] : memref<32x32xf32, #tpu.memory_space<vmem>>, vector<32x32xf32>
    %61 = arith.truncf %59 : vector<8x32xf32> to vector<8x32xbf16>
    %62 = arith.truncf %60 : vector<32x32xf32> to vector<32x32xbf16>
    %cst_22 = arith.constant dense<0.000000e+00> : vector<8x32xf32>
    %63 = tpu.matmul %61, %62, %cst_22 {dimension_numbers = #tpu.dot_dimension_numbers<[1], [0], [0], [1], [0, 0, 1, 1], [], []>} : vector<8x32xbf16>, vector<32x32xbf16>, vector<8x32xf32> -> vector<8x32xf32>
    %c0_23 = arith.constant 0 : index
    %c0_24 = arith.constant 0 : index
    %64 = vector.load %arg7[%c0_23, %c0_24] : memref<1x32xf32, #tpu.memory_space<vmem>>, vector<1x32xf32>
    %65 = vector.broadcast %64 : vector<1x32xf32> to vector<8x32xf32>
    %66 = arith.addf %63, %65 : vector<8x32xf32>
    %67 = arith.addf %1, %66 : vector<8x32xf32>
    %c0_25 = arith.constant 0 : index
    %c0_26 = arith.constant 0 : index
    %c0_27 = arith.constant 0 : index
    %68 = vector.load %arg8[%c0_25, %c0_26, %c0_27] : memref<1x8x32xf32, #tpu.memory_space<vmem>>, vector<1x8x32xf32>
    %69 = vector.shape_cast %68 : vector<1x8x32xf32> to vector<8x32xf32>
    %70 = vector.shape_cast %67 : vector<8x32xf32> to vector<1x8x32xf32>
    tpu.vector_store %arg8[%c0_25, %c0_26, %c0_27], %70 {strides = array<i32>} : memref<1x8x32xf32, #tpu.memory_space<vmem>>, vector<1x8x32xf32>,
    return
  }
  func.func @transform_0(%arg0: i32) -> (i32, i32, i32) {
    %c0_i32 = arith.constant 0 : i32
    %c0_i32_0 = arith.constant 0 : i32
    %c0_i32_1 = arith.constant 0 : i32
    return %arg0, %c0_i32, %c0_i32_0 : i32, i32, i32
  }
  func.func @transform_1(%arg0: i32) -> (i32, i32) {
    %c0_i32 = arith.constant 0 : i32
    %c0_i32_0 = arith.constant 0 : i32
    %c0_i32_1 = arith.constant 0 : i32
    return %c0_i32, %c0_i32_0 : i32, i32
  }
  func.func @transform_2(%arg0: i32) -> (i32, i32) {
    %c0_i32 = arith.constant 0 : i32
    %c0_i32_0 = arith.constant 0 : i32
    %c0_i32_1 = arith.constant 0 : i32
    return %c0_i32, %c0_i32_0 : i32, i32
  }
  func.func @transform_3(%arg0: i32) -> (i32, i32) {
    %c0_i32 = arith.constant 0 : i32
    %c0_i32_0 = arith.constant 0 : i32
    %c0_i32_1 = arith.constant 0 : i32
    return %c0_i32, %c0_i32_0 : i32, i32
  }
  func.func @transform_4(%arg0: i32) -> (i32, i32) {
    %c0_i32 = arith.constant 0 : i32
    %c0_i32_0 = arith.constant 0 : i32
    %c0_i32_1 = arith.constant 0 : i32
    return %c0_i32, %c0_i32_0 : i32, i32
  }
  func.func @transform_5(%arg0: i32) -> (i32, i32) {
    %c0_i32 = arith.constant 0 : i32
    %c0_i32_0 = arith.constant 0 : i32
    %c0_i32_1 = arith.constant 0 : i32
    return %c0_i32, %c0_i32_0 : i32, i32
  }
  func.func @transform_6(%arg0: i32) -> (i32, i32) {
    %c0_i32 = arith.constant 0 : i32
    %c0_i32_0 = arith.constant 0 : i32
    %c0_i32_1 = arith.constant 0 : i32
    return %c0_i32, %c0_i32_0 : i32, i32
  }
  func.func @transform_7(%arg0: i32) -> (i32, i32, i32) {
    %c0_i32 = arith.constant 0 : i32
    %c0_i32_0 = arith.constant 0 : i32
    %c0_i32_1 = arith.constant 0 : i32
    return %arg0, %c0_i32, %c0_i32_0 : i32, i32, i32
  }
}

module attributes {stable_mosaic.version = 11 : i64} {
  func.func @text_proj_kernel(%arg0: i32, %arg1: memref<16x32xf32, #tpu.memory_space<vmem>>, %arg2: memref<32x32xf32, #tpu.memory_space<vmem>>, %arg3: memref<1x32xf32, #tpu.memory_space<vmem>>, %arg4: memref<32x32xf32, #tpu.memory_space<vmem>>, %arg5: memref<1x32xf32, #tpu.memory_space<vmem>>, %arg6: memref<16x32xf32, #tpu.memory_space<vmem>>) attributes {dimension_semantics = [#tpu.dimension_semantics<parallel>], iteration_bounds = array<i64: 1>, scalar_prefetch = 0 : i64, scratch_operands = 0 : i64, tpu.core_type = #tpu.core_type<tc>, window_params = [{transform_indices = @transform_0, window_bounds = array<i64: 16, 32>}, {pipeline_mode = #tpu.pipeline_mode<synchronous>, transform_indices = @transform_1, window_bounds = array<i64: 32, 32>}, {pipeline_mode = #tpu.pipeline_mode<synchronous>, transform_indices = @transform_2, window_bounds = array<i64: 1, 32>}, {pipeline_mode = #tpu.pipeline_mode<synchronous>, transform_indices = @transform_3, window_bounds = array<i64: 32, 32>}, {pipeline_mode = #tpu.pipeline_mode<synchronous>, transform_indices = @transform_4, window_bounds = array<i64: 1, 32>}, {transform_indices = @transform_5, window_bounds = array<i64: 16, 32>}]} {
    %c0 = arith.constant 0 : index
    %c0_0 = arith.constant 0 : index
    %0 = vector.load %arg1[%c0, %c0_0] : memref<16x32xf32, #tpu.memory_space<vmem>>, vector<16x32xf32>
    %c0_1 = arith.constant 0 : index
    %c0_2 = arith.constant 0 : index
    %1 = vector.load %arg2[%c0_1, %c0_2] : memref<32x32xf32, #tpu.memory_space<vmem>>, vector<32x32xf32>
    %2 = arith.truncf %0 : vector<16x32xf32> to vector<16x32xbf16>
    %3 = arith.truncf %1 : vector<32x32xf32> to vector<32x32xbf16>
    %cst = arith.constant dense<0.000000e+00> : vector<16x32xf32>
    %4 = tpu.matmul %2, %3, %cst {dimension_numbers = #tpu.dot_dimension_numbers<[1], [0], [0], [1], [0, 0, 1, 1], [], []>} : vector<16x32xbf16>, vector<32x32xbf16>, vector<16x32xf32> -> vector<16x32xf32>
    %c0_3 = arith.constant 0 : index
    %c0_4 = arith.constant 0 : index
    %5 = vector.load %arg3[%c0_3, %c0_4] : memref<1x32xf32, #tpu.memory_space<vmem>>, vector<1x32xf32>
    %6 = vector.broadcast %5 : vector<1x32xf32> to vector<16x32xf32>
    %7 = arith.addf %4, %6 : vector<16x32xf32>
    %cst_5 = arith.constant 5.000000e-01 : f32
    %8 = vector.broadcast %cst_5 : f32 to vector<16x32xf32>
    %9 = arith.mulf %8, %7 : vector<16x32xf32>
    %cst_6 = arith.constant 4.471500e-02 : f32
    %10 = vector.broadcast %cst_6 : f32 to vector<16x32xf32>
    %11 = arith.mulf %10, %7 : vector<16x32xf32>
    %12 = arith.mulf %11, %7 : vector<16x32xf32>
    %13 = arith.mulf %12, %7 : vector<16x32xf32>
    %14 = arith.addf %7, %13 : vector<16x32xf32>
    %cst_7 = arith.constant 0.797884583 : f32
    %15 = vector.broadcast %cst_7 : f32 to vector<16x32xf32>
    %16 = arith.mulf %15, %14 : vector<16x32xf32>
    %17 = math.tanh %16 : vector<16x32xf32>
    %cst_8 = arith.constant 1.000000e+00 : f32
    %18 = vector.broadcast %cst_8 : f32 to vector<16x32xf32>
    %19 = arith.addf %18, %17 : vector<16x32xf32>
    %20 = arith.mulf %9, %19 : vector<16x32xf32>
    %c0_9 = arith.constant 0 : index
    %c0_10 = arith.constant 0 : index
    %21 = vector.load %arg4[%c0_9, %c0_10] : memref<32x32xf32, #tpu.memory_space<vmem>>, vector<32x32xf32>
    %22 = arith.truncf %20 : vector<16x32xf32> to vector<16x32xbf16>
    %23 = arith.truncf %21 : vector<32x32xf32> to vector<32x32xbf16>
    %cst_11 = arith.constant dense<0.000000e+00> : vector<16x32xf32>
    %24 = tpu.matmul %22, %23, %cst_11 {dimension_numbers = #tpu.dot_dimension_numbers<[1], [0], [0], [1], [0, 0, 1, 1], [], []>} : vector<16x32xbf16>, vector<32x32xbf16>, vector<16x32xf32> -> vector<16x32xf32>
    %c0_12 = arith.constant 0 : index
    %c0_13 = arith.constant 0 : index
    %25 = vector.load %arg5[%c0_12, %c0_13] : memref<1x32xf32, #tpu.memory_space<vmem>>, vector<1x32xf32>
    %26 = vector.broadcast %25 : vector<1x32xf32> to vector<16x32xf32>
    %27 = arith.addf %24, %26 : vector<16x32xf32>
    %c0_14 = arith.constant 0 : index
    %c0_15 = arith.constant 0 : index
    %28 = vector.load %arg6[%c0_14, %c0_15] : memref<16x32xf32, #tpu.memory_space<vmem>>, vector<16x32xf32>
    tpu.vector_store %arg6[%c0_14, %c0_15], %27 {strides = array<i32>} : memref<16x32xf32, #tpu.memory_space<vmem>>, vector<16x32xf32>,
    return
  }
  func.func @transform_0(%arg0: i32) -> (i32, i32) {
    %c0_i32 = arith.constant 0 : i32
    %c0_i32_0 = arith.constant 0 : i32
    return %arg0, %c0_i32 : i32, i32
  }
  func.func @transform_1(%arg0: i32) -> (i32, i32) {
    %c0_i32 = arith.constant 0 : i32
    %c0_i32_0 = arith.constant 0 : i32
    %c0_i32_1 = arith.constant 0 : i32
    return %c0_i32, %c0_i32_0 : i32, i32
  }
  func.func @transform_2(%arg0: i32) -> (i32, i32) {
    %c0_i32 = arith.constant 0 : i32
    %c0_i32_0 = arith.constant 0 : i32
    %c0_i32_1 = arith.constant 0 : i32
    return %c0_i32, %c0_i32_0 : i32, i32
  }
  func.func @transform_3(%arg0: i32) -> (i32, i32) {
    %c0_i32 = arith.constant 0 : i32
    %c0_i32_0 = arith.constant 0 : i32
    %c0_i32_1 = arith.constant 0 : i32
    return %c0_i32, %c0_i32_0 : i32, i32
  }
  func.func @transform_4(%arg0: i32) -> (i32, i32) {
    %c0_i32 = arith.constant 0 : i32
    %c0_i32_0 = arith.constant 0 : i32
    %c0_i32_1 = arith.constant 0 : i32
    return %c0_i32, %c0_i32_0 : i32, i32
  }
  func.func @transform_5(%arg0: i32) -> (i32, i32) {
    %c0_i32 = arith.constant 0 : i32
    %c0_i32_0 = arith.constant 0 : i32
    return %arg0, %c0_i32 : i32, i32
  }
}

module attributes {stable_mosaic.version = 11 : i64} {
  func.func @layernorm_kernel(%arg0: i32, %arg1: memref<16x32xf32, #tpu.memory_space<vmem>>, %arg2: memref<1x32xf32, #tpu.memory_space<vmem>>, %arg3: memref<1x32xf32, #tpu.memory_space<vmem>>, %arg4: memref<16x32xf32, #tpu.memory_space<vmem>>) attributes {dimension_semantics = [#tpu.dimension_semantics<parallel>], iteration_bounds = array<i64: 1>, scalar_prefetch = 0 : i64, scratch_operands = 0 : i64, tpu.core_type = #tpu.core_type<tc>, window_params = [{transform_indices = @transform_0, window_bounds = array<i64: 16, 32>}, {pipeline_mode = #tpu.pipeline_mode<synchronous>, transform_indices = @transform_1, window_bounds = array<i64: 1, 32>}, {pipeline_mode = #tpu.pipeline_mode<synchronous>, transform_indices = @transform_2, window_bounds = array<i64: 1, 32>}, {transform_indices = @transform_3, window_bounds = array<i64: 16, 32>}]} {
    %c0 = arith.constant 0 : index
    %c0_0 = arith.constant 0 : index
    %0 = vector.load %arg1[%c0, %c0_0] : memref<16x32xf32, #tpu.memory_space<vmem>>, vector<16x32xf32>
    %c0_1 = arith.constant 0 : index
    %c0_2 = arith.constant 0 : index
    %1 = vector.load %arg2[%c0_1, %c0_2] : memref<1x32xf32, #tpu.memory_space<vmem>>, vector<1x32xf32>
    %c0_3 = arith.constant 0 : index
    %c0_4 = arith.constant 0 : index
    %2 = vector.load %arg3[%c0_3, %c0_4] : memref<1x32xf32, #tpu.memory_space<vmem>>, vector<1x32xf32>
    %cst = arith.constant dense<0.000000e+00> : vector<16xf32>
    %3 = vector.multi_reduction <add>, %0, %cst [1] : vector<16x32xf32> to vector<16xf32>
    %4 = vector.shape_cast %3 : vector<16xf32> to vector<16x1xf32>
    %cst_5 = arith.constant 3.200000e+01 : f32
    %5 = vector.broadcast %cst_5 : f32 to vector<16x1xf32>
    %6 = arith.divf %4, %5 : vector<16x1xf32>
    %7 = vector.broadcast %6 : vector<16x1xf32> to vector<16x32xf32>
    %8 = arith.subf %0, %7 : vector<16x32xf32>
    %9 = arith.mulf %8, %8 : vector<16x32xf32>
    %cst_6 = arith.constant dense<0.000000e+00> : vector<16xf32>
    %10 = vector.multi_reduction <add>, %9, %cst_6 [1] : vector<16x32xf32> to vector<16xf32>
    %11 = vector.shape_cast %10 : vector<16xf32> to vector<16x1xf32>
    %cst_7 = arith.constant 3.200000e+01 : f32
    %12 = vector.broadcast %cst_7 : f32 to vector<16x1xf32>
    %13 = arith.divf %11, %12 : vector<16x1xf32>
    %cst_8 = arith.constant 9.99999974E-6 : f32
    %14 = vector.broadcast %cst_8 : f32 to vector<16x1xf32>
    %15 = arith.addf %13, %14 : vector<16x1xf32>
    %16 = math.rsqrt %15 : vector<16x1xf32>
    %17 = vector.broadcast %16 : vector<16x1xf32> to vector<16x32xf32>
    %18 = arith.mulf %8, %17 : vector<16x32xf32>
    %19 = vector.broadcast %1 : vector<1x32xf32> to vector<16x32xf32>
    %20 = arith.mulf %18, %19 : vector<16x32xf32>
    %21 = vector.broadcast %2 : vector<1x32xf32> to vector<16x32xf32>
    %22 = arith.addf %20, %21 : vector<16x32xf32>
    %c0_9 = arith.constant 0 : index
    %c0_10 = arith.constant 0 : index
    %23 = vector.load %arg4[%c0_9, %c0_10] : memref<16x32xf32, #tpu.memory_space<vmem>>, vector<16x32xf32>
    tpu.vector_store %arg4[%c0_9, %c0_10], %22 {strides = array<i32>} : memref<16x32xf32, #tpu.memory_space<vmem>>, vector<16x32xf32>,
    return
  }
  func.func @transform_0(%arg0: i32) -> (i32, i32) {
    %c0_i32 = arith.constant 0 : i32
    %c0_i32_0 = arith.constant 0 : i32
    return %arg0, %c0_i32 : i32, i32
  }
  func.func @transform_1(%arg0: i32) -> (i32, i32) {
    %c0_i32 = arith.constant 0 : i32
    %c0_i32_0 = arith.constant 0 : i32
    %c0_i32_1 = arith.constant 0 : i32
    return %c0_i32, %c0_i32_0 : i32, i32
  }
  func.func @transform_2(%arg0: i32) -> (i32, i32) {
    %c0_i32 = arith.constant 0 : i32
    %c0_i32_0 = arith.constant 0 : i32
    %c0_i32_1 = arith.constant 0 : i32
    return %c0_i32, %c0_i32_0 : i32, i32
  }
  func.func @transform_3(%arg0: i32) -> (i32, i32) {
    %c0_i32 = arith.constant 0 : i32
    %c0_i32_0 = arith.constant 0 : i32
    return %arg0, %c0_i32 : i32, i32
  }
}

</mosaic_0001>

<bundles_post_ra>
// kernel: text_embedding_forward.6
= control target key start
LH: loop header
LB: loop body
LE: loop exit
PB: predicated region body
PF: predicated region fallthrough
CT: control target
= control target key end

     0   :  { %v196_v0 = vmov 0.0   ;;  %vm197_vm0 = vmmov 0   ;;  %vm37_vm1 = vcmask 261120   ;;  %s274_s1 = inlined_call_operand.vmem [shape: f32[32,32], index: 1, kind: input, shape index: {}]   ;;  %s275_s0 = inlined_call_operand.vmem [shape: f32[16,32], index: 0, kind: input, shape index: {}]   ;;  %s276_s3 = inlined_call_operand.vmem [shape: f32[32,32], index: 3, kind: input, shape index: {}]   ;;  %s277_s2 = inlined_call_operand.vmem [shape: f32[1,32], index: 2, kind: input, shape index: {}]   ;;  %s278_s4 = inlined_call_operand.vmem [shape: f32[1,32], index: 4, kind: input, shape index: {}]   ;;  %s279_s5 = inlined_call_operand.vmem [shape: f32[16,32], index: 5, kind: output, shape index: {}]  }
   0x1   :  { %174 = vmatprep.subr.bf16.mxu0 %v196_v0  ;;  %v23_v1 = vld [vmem:[%s274_s1] sm:$0xff]  ;;  %v24_v2 = vld [vmem:[%s274_s1 + $0x8] sm:$0xff]  ;;  %v25_v3 = vld [vmem:[%s274_s1 + $0x10] sm:$0xff]  ;;  %178 = vmatprep.mubr.msk.bf16.mxu0 %vm197_vm0, %v196_v0 }
   0x2   :  { %v28_v4 = vpack.c.bf16 %v24_v2, %v23_v1  ;;  %v26_v5 = vld [vmem:[%s274_s1 + $0x18] sm:$0xff]  ;;  %182 = vmatprep.subr.bf16.mxu1 %v196_v0  ;;  %186 = vmatprep.mubr.msk.bf16.mxu1 %vm197_vm0, %v196_v0  ;;  %v21_v7 = vld [vmem:[%s275_s0] sm:$0xff]  ;;  %v22_v8 = vld [vmem:[%s275_s0 + $0x8] sm:$0xff] }
   0x3   :  { %v29_v6 = vpack.c.bf16 %v26_v5, %v25_v3  ;;  %v27_v9 = vpack.c.bf16 %v22_v8, %v21_v7  ;;  %v100_v10 = vld [vmem:[%s276_s3] sm:$0xff]  ;;  %v101_v11 = vld [vmem:[%s276_s3 + $0x8] sm:$0xff]  ;;  %v102_v12 = vld [vmem:[%s276_s3 + $0x10] sm:$0xff] }
   0x4   :  { %175 = vmatpush3.bf16.msra.mxu0 %v28_v4  ;;  %v105_v13 = vpack.c.bf16 %v101_v11, %v100_v10  ;;  %v103_v14 = vld [vmem:[%s276_s3 + $0x18] sm:$0xff]  ;;  %v164_v16 = vld [vmem:[%s277_s2] ss:$0 sm:$0xff] }
   0x5   :  { %176 = vmatprep.subr.bf16.mxu0 %v196_v0  ;;  %v106_v15 = vpack.c.bf16 %v103_v14, %v102_v12  ;;  %v166_v42 = vld [vmem:[%s278_s4] ss:$0 sm:$0xff] }
   0x6   :  { %183 = vmatpush3.bf16.msra.mxu1 %v105_v13 }
   0x7   :  { %184 = vmatprep.subr.bf16.mxu1 %v196_v0 }
   0x8   :  { %177 = vmatpush3.bf16.msra.mxu0 %v29_v6 }
   0xa   :  { %185 = vmatpush3.bf16.msra.mxu1 %v106_v15 }
   0xb   :  { %179 = vmatmul.mubr.msk.bf16.vlgmr.msra.gmra.mrb[0].mxu0 %vm37_vm1, %v27_v9 }
  0xde   :  { %v75_v17 = vpop.f32.mrb[0].mxu0 }
  0xdf   :  { %v76_v18 = vadd.f32 %v164_v16, %v75_v17  ;;  %v180_v19 = vpop.f32.mrb[1].mxu0 }
  0xe0   :  { %v78_v20 = vpop.f32.mrb[2].mxu0 }
  0xe1   :  { %v84_v21 = vmul.f32 0.044715, %v76_v18  ;;  %v79_v22 = vadd.f32 %v164_v16, %v78_v20  ;;  %v181_v23 = vpop.f32.mrb[3].mxu0  ;;  %v82_v36 = vmul.f32 0.5, %v76_v18 }
  0xe3   :  { %v86_v24 = vmul.f32 %v84_v21, %v76_v18  ;;  %v85_v25 = vmul.f32 0.044715, %v79_v22  ;;  %v83_v37 = vmul.f32 0.5, %v79_v22 }
  0xe5   :  { %v88_v26 = vmul.f32 %v86_v24, %v76_v18  ;;  %v87_v27 = vmul.f32 %v85_v25, %v79_v22 }
  0xe7   :  { %v90_v28 = vadd.f32 %v88_v26, %v76_v18  ;;  %v89_v29 = vmul.f32 %v87_v27, %v79_v22 }
  0xe9   :  { %v92_v30 = vmul.f32 0.7978846, %v90_v28  ;;  %v91_v31 = vadd.f32 %v89_v29, %v79_v22 }
  0xeb   :  { %192 = vtanh.f32 %v92_v30  ;;  %v93_v32 = vmul.f32 0.7978846, %v91_v31 }
  0xed   :  { %194 = vtanh.f32 %v93_v32 }
  0xf5   :  { %v193_v33 = vpop.eup %192 }
  0xf6   :  { %v96_v34 = vadd.f32 1.0, %v193_v33 }
  0xf7   :  { %v195_v35 = vpop.eup %194 }
  0xf8   :  { %v97_v38 = vadd.f32 1.0, %v195_v35  ;;  %v98_v39 = vmul.f32 %v96_v34, %v82_v36 }
  0xfa   :  { %v99_v40 = vmul.f32 %v97_v38, %v83_v37 }
  0xfc   :  { %v104_v41 = vpack.c.bf16 %v99_v40, %v98_v39 }
  0xfe   :  { %187 = vmatmul.mubr.msk.bf16.vlgmr.msra.gmra.mrb[0].mxu1 %vm37_vm1, %v104_v41 }
 0x1d1   :  { %v151_v43 = vpop.f32.mrb[0].mxu1 }
 0x1d2   :  { %v152_v44 = vadd.f32 %v166_v42, %v151_v43  ;;  %v188_v45 = vpop.f32.mrb[1].mxu1 }
 0x1d3   :  { %v154_v46 = vpop.f32.mrb[2].mxu1 }
 0x1d4   :  { %158 = vst.msk [vmem:[%s279_s5] sm:$0xff] %vm37_vm1, %v152_v44  ;;  %v155_v47 = vadd.f32 %v166_v42, %v154_v46  ;;  %v189_v48 = vpop.f32.mrb[3].mxu1 }
 0x1d6   :  { %159 = vst.msk [vmem:[%s279_s5 + $0x8] sm:$0xff] %vm37_vm1, %v155_v47 }

// kernel: text_embedding_forward.8
= control target key start
LH: loop header
LB: loop body
LE: loop exit
PB: predicated region body
PF: predicated region fallthrough
CT: control target
= control target key end

     0   :  { %vm31_vm0 = vcmask 261120   ;;  %v279_v17 = vmov 0.0   ;;  %vm280_vm1 = vmmov 0   ;;  %s434_s0 = inlined_call_operand.vmem [shape: f32[16,32], index: 0, kind: input, shape index: {}]   ;;  %s435_s3 = inlined_call_operand.vmem [shape: f32[32,128], index: 3, kind: input, shape index: {}]   ;;  %s436_s5 = inlined_call_operand.vmem [shape: f32[128,32], index: 5, kind: input, shape index: {}]   ;;  %s437_s1 = inlined_call_operand.vmem [shape: f32[1,32], index: 1, kind: input, shape index: {}]   ;;  %s438_s2 = inlined_call_operand.vmem [shape: f32[1,32], index: 2, kind: input, shape index: {}]   ;;  %s439_s4 = inlined_call_operand.vmem [shape: f32[1,128], index: 4, kind: input, shape index: {}]   ;;  %s440_s6 = inlined_call_operand.vmem [shape: f32[1,32], index: 6, kind: input, shape index: {}]   ;;  %s441_s7 = inlined_call_operand.vmem [shape: f32[16,32], index: 7, kind: output, shape index: {}]  }
   0x1   :  { %v324_v0 = vld [vmem:[%s434_s0] sm:$0xff]  ;;  %v329_v1 = vld [vmem:[%s434_s0 + $0x8] sm:$0xff]  ;;  %241 = vmatprep.subr.bf16.mxu0 %v279_v17  ;;  %v77_v18 = vld [vmem:[%s435_s3 + $0x10] sm:$0xff]  ;;  %249 = vmatprep.subr.bf16.mxu1 %v279_v17 }
   0x2   :  { %v32_v2 = vsel %vm31_vm0, %v324_v0, 0.0  ;;  %v35_v3 = vsel %vm31_vm0, %v329_v1, 0.0  ;;  %v75_v14 = vld [vmem:[%s435_s3] sm:$0xff]  ;;  %v76_v15 = vld [vmem:[%s435_s3 + $0x8] sm:$0xff]  ;;  %v78_v19 = vld [vmem:[%s435_s3 + $0x18] sm:$0xff]  ;;  %245 = vmatprep.mubr.msk.bf16.mxu0 %vm280_vm1, %v279_v17  ;;  %265 = vmatprep.mubr.msk.bf16.mxu1 %vm280_vm1, %v279_v17 }
   0x3   :  { %33 = vadd.xlane.f32.xlu0 %v32_v2  ;;  %v80_v16 = vpack.c.bf16 %v76_v15, %v75_v14  ;;  %v81_v20 = vpack.c.bf16 %v78_v19, %v77_v18  ;;  %v143_v21 = vld [vmem:[%s436_s5] sm:$0xff]  ;;  %v144_v22 = vld [vmem:[%s436_s5 + $0x8] sm:$0xff]  ;;  %v145_v23 = vld [vmem:[%s436_s5 + $0x10] sm:$0xff] }
   0x4   :  { %v160_v24 = vpack.c.bf16 %v144_v22, %v143_v21  ;;  %v146_v25 = vld [vmem:[%s436_s5 + $0x18] sm:$0xff]  ;;  %v224_v35 = vld [vmem:[%s437_s1] ss:$0 sm:$0xff]  ;;  %v148_v45 = vld [vmem:[%s436_s5 + $0x28] sm:$0xff] }
   0x5   :  { %242 = vmatpush3.bf16.msra.mxu0 %v80_v16  ;;  %v161_v26 = vpack.c.bf16 %v146_v25, %v145_v23  ;;  %v225_v39 = vld [vmem:[%s438_s2] ss:$0 sm:$0xff]  ;;  %v149_v47 = vld [vmem:[%s436_s5 + $0x30] sm:$0xff]  ;;  %v150_v48 = vld [vmem:[%s436_s5 + $0x38] sm:$0xff] }
   0x6   :  { %243 = vmatprep.subr.bf16.mxu0 %v279_v17  ;;  %250 = vmatpush3.bf16.msra.mxu1 %v160_v24  ;;  %v147_v44 = vld [vmem:[%s436_s5 + $0x20] sm:$0xff]  ;;  %v163_v49 = vpack.c.bf16 %v150_v48, %v149_v47  ;;  %v152_v51 = vld [vmem:[%s436_s5 + $0x48] sm:$0xff]  ;;  %v153_v53 = vld [vmem:[%s436_s5 + $0x50] sm:$0xff] }
   0x7   :  { %36 = vadd.xlane.f32.xlu0 %v35_v3  ;;  %251 = vmatprep.subr.bf16.mxu1 %v279_v17  ;;  %v162_v46 = vpack.c.bf16 %v148_v45, %v147_v44  ;;  %v151_v50 = vld [vmem:[%s436_s5 + $0x40] sm:$0xff]  ;;  %v154_v54 = vld [vmem:[%s436_s5 + $0x58] sm:$0xff]  ;;  %v156_v57 = vld [vmem:[%s436_s5 + $0x68] sm:$0xff] }
   0x8   :  { %v164_v52 = vpack.c.bf16 %v152_v51, %v151_v50  ;;  %v165_v55 = vpack.c.bf16 %v154_v54, %v153_v53  ;;  %v155_v56 = vld [vmem:[%s436_s5 + $0x60] sm:$0xff]  ;;  %v157_v59 = vld [vmem:[%s436_s5 + $0x70] sm:$0xff]  ;;  %v158_v60 = vld [vmem:[%s436_s5 + $0x78] sm:$0xff] }
   0x9   :  { %244 = vmatpush3.bf16.msra.mxu0 %v81_v20  ;;  %v166_v58 = vpack.c.bf16 %v156_v57, %v155_v56  ;;  %v167_v61 = vpack.c.bf16 %v158_v60, %v157_v59  ;;  %v226_v62 = vld [vmem:[%s439_s4] ss:$0 sm:$0xff] }
   0xa   :  { %252 = vmatpush3.bf16.msra.mxu1 %v161_v26  ;;  %v228_v18 = vld [vmem:[%s440_s6] ss:$0 sm:$0xff] }
   0xb   :  { %253 = vmatprep.subr.bf16.mxu1 %v279_v17 }
   0xe   :  { %254 = vmatpush3.bf16.msra.mxu1 %v162_v46 }
   0xf   :  { %255 = vmatprep.subr.bf16.mxu1 %v279_v17 }
  0x12   :  { %256 = vmatpush3.bf16.msra.mxu1 %v163_v49 }
  0x13   :  { %257 = vmatprep.subr.bf16.mxu1 %v279_v17 }
  0x16   :  { %258 = vmatpush3.bf16.msra.mxu1 %v164_v52 }
  0x17   :  { %259 = vmatprep.subr.bf16.mxu1 %v279_v17 }
  0x1a   :  { %260 = vmatpush3.bf16.msra.mxu1 %v165_v55 }
  0x1b   :  { %261 = vmatprep.subr.bf16.mxu1 %v279_v17 }
  0x1e   :  { %262 = vmatpush3.bf16.msra.mxu1 %v166_v58 }
  0x1f   :  { %263 = vmatprep.subr.bf16.mxu1 %v279_v17 }
  0x22   :  { %264 = vmatpush3.bf16.msra.mxu1 %v167_v61 }
  0x90   :  { %v34_v4 = vpop.xlane.xlu0 %33 }
  0x91   :  { %v39_v5 = vmul.f32 0.03125, %v34_v4 }
  0x93   :  { %v41_v6 = vsub.f32 %v324_v0, %v39_v5 }
  0x94   :  { %v37_v7 = vpop.xlane.xlu0 %36 }
  0x95   :  { %v40_v8 = vmul.f32 0.03125, %v37_v7  ;;  %v43_v9 = vmul.f32 %v41_v6, %v41_v6 }
  0x97   :  { %v42_v10 = vsub.f32 %v329_v1, %v40_v8  ;;  %v45_v11 = vsel %vm31_vm0, %v43_v9, 0.0 }
  0x98   :  { %46 = vadd.xlane.f32.xlu1 %v45_v11 }
  0x99   :  { %v44_v12 = vmul.f32 %v42_v10, %v42_v10 }
  0x9b   :  { %v48_v13 = vsel %vm31_vm0, %v44_v12, 0.0 }
  0x9c   :  { %49 = vadd.xlane.f32.xlu1 %v48_v13 }
 0x125   :  { %v47_v27 = vpop.xlane.xlu1 %46 }
 0x126   :  { %v51_v28 = vmul.f32 0.03125, %v47_v27 }
 0x128   :  { %v53_v29 = vadd.f32 1e-05, %v51_v28 }
 0x129   :  { %v50_v30 = vpop.xlane.xlu1 %49 }
 0x12a   :  { %271 = vrsqrt.f32 %v53_v29  ;;  %v52_v31 = vmul.f32 0.03125, %v50_v30 }
 0x12c   :  { %v54_v32 = vadd.f32 1e-05, %v52_v31 }
 0x12e   :  { %273 = vrsqrt.f32 %v54_v32 }
 0x134   :  { %v272_v33 = vpop.eup %271 }
 0x135   :  { %v57_v34 = vmul.f32 %v272_v33, %v41_v6 }
 0x137   :  { %v65_v38 = vmul.f32 %v224_v35, %v57_v34 }
 0x138   :  { %v274_v36 = vpop.eup %273 }
 0x139   :  { %v58_v37 = vmul.f32 %v274_v36, %v42_v10  ;;  %v73_v41 = vadd.f32 %v225_v39, %v65_v38 }
 0x13b   :  { %v66_v40 = vmul.f32 %v224_v35, %v58_v37 }
 0x13d   :  { %v74_v42 = vadd.f32 %v225_v39, %v66_v40 }
 0x13f   :  { %v79_v43 = vpack.c.bf16 %v74_v42, %v73_v41 }
 0x141   :  { %246 = vmatmul.mubr.msk.bf16.vlgmr.msra.gmra.mrb[0].mxu0 %vm31_vm0, %v79_v43 }
 0x214   :  { %v126_v63 = vpop.f32.mrb[0].mxu0 }
 0x215   :  { %v127_v2 = vadd.f32 %v226_v62, %v126_v63  ;;  %v247_v3 = vpop.f32.mrb[1].mxu0 }
 0x216   :  { %v129_v4 = vpop.f32.mrb[2].mxu0 }
 0x217   :  { %v135_v5 = vmul.f32 0.70710677, %v127_v2  ;;  %v130_v6 = vadd.f32 %v226_v62, %v129_v4  ;;  %v248_v7 = vpop.f32.mrb[3].mxu0  ;;  %v133_v12 = vmul.f32 0.5, %v127_v2 }
 0x219   :  { %275 = verf.f32 %v135_v5  ;;  %v136_v8 = vmul.f32 0.70710677, %v130_v6  ;;  %v134_v13 = vmul.f32 0.5, %v130_v6 }
 0x21b   :  { %277 = verf.f32 %v136_v8 }
 0x223   :  { %v276_v9 = vpop.eup %275 }
 0x224   :  { %v139_v10 = vadd.f32 1.0, %v276_v9 }
 0x225   :  { %v278_v11 = vpop.eup %277 }
 0x226   :  { %v140_v14 = vadd.f32 1.0, %v278_v11  ;;  %v141_v15 = vmul.f32 %v139_v10, %v133_v12 }
 0x228   :  { %v142_v16 = vmul.f32 %v140_v14, %v134_v13 }
 0x22a   :  { %v159_v17 = vpack.c.bf16 %v142_v16, %v141_v15 }
 0x22c   :  { %266 = vmatmul.mubr.bf16.vlgmr.msra.gmra.mrb[0].mxu1 %v159_v17 }
 0x2ff   :  { %v209_v19 = vpop.f32.mrb[0].mxu1 }
 0x300   :  { %v210_v20 = vadd.f32 %v228_v18, %v209_v19  ;;  %v267_v21 = vpop.f32.mrb[1].mxu1 }
 0x301   :  { %v212_v22 = vpop.f32.mrb[2].mxu1 }
 0x302   :  { %v216_v23 = vadd.f32 %v210_v20, %v324_v0  ;;  %v213_v24 = vadd.f32 %v228_v18, %v212_v22  ;;  %v268_v25 = vpop.f32.mrb[3].mxu1 }
 0x304   :  { %218 = vst.msk [vmem:[%s441_s7] sm:$0xff] %vm31_vm0, %v216_v23  ;;  %v217_v26 = vadd.f32 %v213_v24, %v329_v1 }
 0x306   :  { %219 = vst.msk [vmem:[%s441_s7 + $0x8] sm:$0xff] %vm31_vm0, %v217_v26 }

// kernel: text_embedding_forward.7
= control target key start
LH: loop header
LB: loop body
LE: loop exit
PB: predicated region body
PF: predicated region fallthrough
CT: control target
= control target key end

     0   :  { %s1720_s24 = smov 0   ;;  %s1958_s0 = inlined_call_operand.vmem [shape: f32[2,8,32], index: 0, kind: input, shape index: {}]   ;;  %s1959_s1 = inlined_call_operand.vmem [shape: f32[1,32], index: 1, kind: input, shape index: {}]   ;;  %s1960_s2 = inlined_call_operand.vmem [shape: f32[1,32], index: 2, kind: input, shape index: {}]   ;;  %s1961_s3 = inlined_call_operand.vmem [shape: f32[32,96], index: 3, kind: input, shape index: {}]   ;;  %s1962_s4 = inlined_call_operand.vmem [shape: f32[1,96], index: 4, kind: input, shape index: {}]   ;;  %s1963_s5 = inlined_call_operand.vmem [shape: f32[32,32], index: 5, kind: input, shape index: {}]   ;;  %s1964_s6 = inlined_call_operand.vmem [shape: f32[1,32], index: 6, kind: input, shape index: {}]   ;;  %s1965_s7 = inlined_call_operand.vmem [shape: f32[2,8,32], index: 7, kind: output, shape index: {}]  }
   0x1 LB: > { %s1505_s25 = sadd.s32 4294967295, %s1666_s24   ;;  %p1509_p0 = scmp.ge.s32.totalorder %s1666_s24, 1  ;;  %s1666_s24 = sphi %s1720_s24, %s17_s24  }
   0x2   : > { %p236_p1 = scmp.lt.s32.totalorder %s1666_s24, 3 }
   0x4   : > { %p237_p2 = pnand %p1509_p0, %p236_p1 }
   0x5   : > { %p266_p3 = scmp.lt.s32.totalorder (!%p237_p2), %s1505_s25, 1  ;;  %vm278_vm0 = vcmask (!%p237_p2), 261120   ;;  %v307_v7 = vld [vmem:[%s1961_s3] sm:$0xff] (!%p237_p2)  ;;  %v308_v8 = vld [vmem:[%s1961_s3 + $0x8] sm:$0xff] (!%p237_p2)  ;;  %v309_v9 = vld [vmem:[%s1961_s3 + $0x10] sm:$0xff] (!%p237_p2)  ;;  %v1668_v10 = vmov (!%p237_p2), 0.0   ;;  %v379_v35 = vlaneseq (!%p237_p2) }
   0x6   : > { %240 = sbr.rel (%p237_p2) target bundleno = 1968 (0x7b0), region = 48  ;;  %1558 = vmatprep.subr.bf16.mxu0 (!%p237_p2), %v1668_v10  ;;  %v312_v11 = vpack.c.bf16 (!%p237_p2), %v308_v8, %v307_v7  ;;  %v310_v12 = vld [vmem:[%s1961_s3 + $0x18] sm:$0xff] (!%p237_p2)  ;;  %vm1669_vm1 = vmmov (!%p237_p2), 0   ;;  %1566 = vmatprep.subr.bf16.mxu1 (!%p237_p2), %v1668_v10  ;;  %v1512_v18 = vld [vmem:[%s1959_s1] ss:$0 sm:$0xff] (!%p237_p2)  ;;  %s1670_s21 = smov (!%p237_p2), 104  }
   0x7   : > { %1562 = vmatprep.mubr.msk.bf16.mxu0 (!%p237_p2), %vm1669_vm1, %v1668_v10  ;;  %1568 = vmatprep.mubr.msk.bf16.mxu1 (!%p237_p2), %vm1669_vm1, %v1668_v10  ;;  %v313_v13 = vpack.c.bf16 (!%p237_p2), %v310_v12, %v309_v9  ;;  %v1513_v20 = vld [vmem:[%s1960_s2] ss:$0 sm:$0xff] (!%p237_p2)  ;;  %s1671_s22 = smov (!%p237_p2), 120   ;;  %s1672_s23 = smov (!%p237_p2), 112   ;;  %v1674_v33 = vmov (!%p237_p2), 1983009808  }
   0x8   : > { %1559 = vmatpush3.bf16.msra.mxu0 (!%p237_p2), %v312_v11  ;;  %v1514_v24 = vld [vmem:[%s1962_s4] ss:$0 sm:$0xff] (!%p237_p2)  ;;  %s1673_s27 = smov (!%p237_p2), 96   ;;  %v377_v34 = vunpack.c.l.s4 (!%p237_p2), %v1674_v33  ;;  %v380_v37 = vshrl.u32 (!%p237_p2), %v379_v35, 7  ;;  %v1675_v39 = vmov (!%p237_p2), 1934713408  }
   0x9   : > { %1560 = vmatprep.subr.bf16.mxu0 (!%p237_p2), %v1668_v10  ;;  %v409_v40 = vunpack.c.l.s4 (!%p237_p2), %v1675_v39  ;;  %vm814_vm2 = vcmask (!%p237_p2), 64512   ;;  %s1676_s28 = smov (!%p237_p2), 64   ;;  %vm1058_vm3 = vcmask (!%p237_p2), 1043456   ;;  %s1677_s14 = smov (!%p237_p2), 16   ;;  %vm1389_vm4 = vcmask (!%p237_p2), 130048  }
   0xa   : > { %v378_v36 = vunpack.c.0.s8 (!%p237_p2), %v377_v34  ;;  %s1678_s15 = smov (!%p237_p2), 8   ;;  %s1679_s16 = smov (!%p237_p2), 24   ;;  %vm1391_vm5 = vcmask (!%p237_p2), 195584  }
   0xb   : > { %v410_v47 = vunpack.c.0.s8 (!%p237_p2), %v409_v40 }
   0xc   : > { %1561 = vmatpush3.bf16.msra.mxu0 (!%p237_p2), %v313_v13  ;;  %v1793_v43 = vsub.s32 (!%p237_p2), %v378_v36, %v380_v37 }
   0xd   : > { %s1967_s25 = smov (!%p266_p3, %s1505_s25), 1  ;;  %1572 = vmatprep.subr.bf16.mxu0 %v1668_v10  ;;  %v1803_v53 = vsub.s32 %v410_v47, %v380_v37 }
   0xe   : > { %s1510_s26 = sshll.u32 %s1967_s25, 3 }
   0xf   : > { %s269_s29 = scalar_lea.vmem %s1958_s0, %s1510_s26 }
  0x10   : > { %v1736_v0 = vld [vmem:[%s269_s29] sm:$0xff] }
  0x11   : > { %v279_v1 = vsel %vm278_vm0, %v1736_v0, 0.0 }
  0x12   : > { %280 = vadd.xlane.f32.xlu0 %v279_v1 }
  0x9f   : > { %v281_v2 = vpop.xlane.xlu0 %280 }
  0xa0   : > { %v283_v3 = vmul.f32 0.03125, %v281_v2 }
  0xa2   : > { %v284_v4 = vsub.f32 %v1736_v0, %v283_v3 }
  0xa4   : > { %v285_v5 = vmul.f32 %v284_v4, %v284_v4 }
  0xa6   : > { %v286_v6 = vsel %vm278_vm0, %v285_v5, 0.0 }
  0xa7   : > { %287 = vadd.xlane.f32.xlu0 %v286_v6 }
 0x134   : > { %v288_v14 = vpop.xlane.xlu0 %287 }
 0x135   : > { %v289_v15 = vmul.f32 0.03125, %v288_v14 }
 0x137   : > { %v290_v16 = vadd.f32 1e-05, %v289_v15 }
 0x139   : > { %1642 = vrsqrt.f32 %v290_v16 }
 0x143   : > { %v1643_v17 = vpop.eup %1642 }
 0x144   : > { %v292_v19 = vmul.f32 %v1643_v17, %v284_v4 }
 0x146   : > { %v299_v21 = vmul.f32 %v1512_v18, %v292_v19 }
 0x148   : > { %v306_v22 = vadd.f32 %v1513_v20, %v299_v21 }
 0x14a   : > { %v311_v23 = vpack.c.bf16 %v306_v22, %v306_v22 }
 0x14c   : > { %1563 = vmatmul.mubr.msk.bf16.vlgmr.msra.gmra.mrb[0].mxu0 %vm278_vm0, %v311_v23 }
 0x14d   : > { %1574 = vmatprep.mubr.msk.bf16.mxu0 %vm1669_vm1, %v1668_v10 }
 0x21f   : > { %v358_v25 = vpop.f32.mrb[0].mxu0 }
 0x220   : > { %v1774_v26 = vadd.f32 %v1514_v24, %v358_v25  ;;  %v1564_v27 = vpop.f32.mrb[1].mxu0 }
 0x221   : > { %v361_v28 = vpop.f32.mrb[2].mxu0 }
 0x222   : > { %371 = vrot.lane.b32.xlu0 %v1774_v26, %s1670_s21  ;;  %365 = vrot.lane.b32.xlu1 %v1774_v26, %s1671_s22  ;;  %v1565_v29 = vpop.f32.mrb[3].mxu0  ;;  %s273_s21 = scalar_lea.vmem %s1965_s7, %s1510_s26 }
 0x226   : > { %368 = vrot.lane.b32.xlu1 %v1774_v26, %s1672_s23 }
 0x22a   : > { %510 = vrot.lane.b32.xlu1 %v1774_v26, %s1673_s27 }
 0x294   : > { %v1780_v30 = vpop.permute.xlu1 %365  ;;  %v1786_v32 = vpop.permute.xlu0 %371 }
 0x295   : > { %512 = vrot.lane.b32.xlu1 %v1780_v30, %s1673_s27  ;;  %v390_v44 = vcombine.low %v1780_v30, %v1786_v32  ;;  %v391_v45 = vcombine.high %v1780_v30, %v1786_v32 }
 0x297   : > { %v398_v50 = vrot.slane %v390_v44, %v1793_v43  ;;  %v405_v51 = vrot.slane %v391_v45, %v1793_v43 }
 0x298   : > { %v1783_v31 = vpop.permute.xlu1 %368 }
 0x299   : > { %514 = vrot.lane.b32.xlu1 %v1783_v31, %s1673_s27  ;;  %v374_v41 = vcombine.low %v1774_v26, %v1783_v31  ;;  %v375_v42 = vcombine.high %v1774_v26, %v1783_v31 }
 0x29b   : > { %v382_v48 = vrot.slane %v374_v41, %v1793_v43  ;;  %v389_v49 = vrot.slane %v375_v42, %v1793_v43 }
 0x29c   : > { %v511_v38 = vpop.permute.xlu1 %510 }
 0x29d   : > { %516 = vrot.lane.b32.xlu1 %v1786_v32, %s1673_s27  ;;  %v406_v54 = vcombine.low %v382_v48, %v398_v50  ;;  %v407_v55 = vcombine.high %v382_v48, %v398_v50  ;;  %v422_v56 = vcombine.low %v389_v49, %v405_v51  ;;  %v423_v57 = vcombine.high %v389_v49, %v405_v51 }
 0x29f   : > { %v414_v63 = vrot.slane %v406_v54, %v1803_v53  ;;  %v421_v1 = vrot.slane %v407_v55, %v1803_v53  ;;  %v430_v2 = vrot.slane %v422_v56, %v1803_v53  ;;  %v437_v3 = vrot.slane %v423_v57, %v1803_v53 }
 0x2a1   : > { %v442_v13 = vcombine.low %v414_v63, %v421_v1  ;;  %v1516_v14 = vcombine.high %v414_v63, %v421_v1  ;;  %v458_v15 = vcombine.low %v430_v2, %v437_v3  ;;  %v1517_v16 = vcombine.high %v430_v2, %v437_v3 }
 0x2a3   : > { %v449_v25 = vrot.slane %v442_v13, %v1793_v43  ;;  %v457_v27 = vrot.slane %v1516_v14, %v1793_v43  ;;  %v465_v28 = vrot.slane %v458_v15, %v1793_v43  ;;  %v473_v29 = vrot.slane %v1517_v16, %v1793_v43 }
 0x2a5   : > { %v474_v44 = vcombine.low %v449_v25, %v457_v27  ;;  %v490_v45 = vcombine.low %v465_v28, %v473_v29 }
 0x2a7   : > { %v498_v54 = vrot.slane %v490_v45, %v1803_v53 }
 0x307   : > { %v513_v46 = vpop.permute.xlu1 %512 }
 0x30b   : > { %v515_v52 = vpop.permute.xlu1 %514 }
 0x30c   : > { %v522_v58 = vcombine.low %v511_v38, %v515_v52  ;;  %v523_v59 = vcombine.high %v511_v38, %v515_v52  ;;  %v482_v52 = vrot.slane %v474_v44, %v1803_v53 }
 0x30e   : > { %v530_v4 = vrot.slane %v522_v58, %v1793_v43  ;;  %v537_v5 = vrot.slane %v523_v59, %v1793_v43  ;;  %v475_v59 = vcombine.high %v449_v25, %v457_v27 }
 0x30f   : > { %v517_v60 = vpop.permute.xlu1 %516 }
 0x310   : > { %v538_v61 = vcombine.low %v513_v46, %v517_v60  ;;  %v539_v62 = vcombine.high %v513_v46, %v517_v60  ;;  %v491_v60 = vcombine.high %v465_v28, %v473_v29 }
 0x312   : > { %v546_v6 = vrot.slane %v538_v61, %v1793_v43  ;;  %v553_v7 = vrot.slane %v539_v62, %v1793_v43  ;;  %v506_v61 = vcombine.low %v482_v52, %v498_v54  ;;  %v507_v62 = vcombine.high %v482_v52, %v498_v54 }
 0x314   : > { %v554_v8 = vcombine.low %v530_v4, %v546_v6  ;;  %v555_v9 = vcombine.high %v530_v4, %v546_v6  ;;  %v570_v11 = vcombine.low %v537_v5, %v553_v7  ;;  %v571_v12 = vcombine.high %v537_v5, %v553_v7 }
 0x315   : > { %v806_v2 = vpack.c.bf16 %v506_v61, %v506_v61  ;;  %v807_v3 = vpack.c.bf16 %v507_v62, %v507_v62  ;;  %v489_v4 = vrot.slane %v475_v59, %v1803_v53  ;;  %v505_v5 = vrot.slane %v491_v60, %v1803_v53 }
 0x316   : > { %v562_v17 = vrot.slane %v554_v8, %v1803_v53  ;;  %v569_v18 = vrot.slane %v555_v9, %v1803_v53  ;;  %v578_v19 = vrot.slane %v570_v11, %v1803_v53  ;;  %v585_v20 = vrot.slane %v571_v12, %v1803_v53 }
 0x317   : > { %v508_v8 = vcombine.low %v489_v4, %v505_v5  ;;  %v509_v9 = vcombine.high %v489_v4, %v505_v5 }
 0x318   : > { %v590_v21 = vcombine.low %v562_v17, %v569_v18  ;;  %v1518_v22 = vcombine.high %v562_v17, %v569_v18  ;;  %v606_v23 = vcombine.low %v578_v19, %v585_v20  ;;  %v1519_v24 = vcombine.high %v578_v19, %v585_v20 }
 0x319   : > { %v808_v11 = vpack.c.bf16 %v508_v8, %v508_v8  ;;  %v809_v12 = vpack.c.bf16 %v509_v9, %v509_v9 }
 0x31a   : > { %v597_v33 = vrot.slane %v590_v21, %v1793_v43  ;;  %v605_v34 = vrot.slane %v1518_v22, %v1793_v43  ;;  %v613_v35 = vrot.slane %v606_v23, %v1793_v43  ;;  %v621_v36 = vrot.slane %v1519_v24, %v1793_v43 }
 0x31c   : > { %v622_v37 = vcombine.low %v597_v33, %v605_v34  ;;  %v638_v38 = vcombine.low %v613_v35, %v621_v36  ;;  %v623_v39 = vcombine.high %v597_v33, %v605_v34  ;;  %v639_v40 = vcombine.high %v613_v35, %v621_v36 }
 0x31e   : > { %v630_v41 = vrot.slane %v622_v37, %v1803_v53  ;;  %v646_v42 = vrot.slane %v638_v38, %v1803_v53  ;;  %v637_v48 = vrot.slane %v623_v39, %v1803_v53  ;;  %v653_v49 = vrot.slane %v639_v40, %v1803_v53 }
 0x320   : > { %v654_v46 = vcombine.low %v630_v41, %v646_v42  ;;  %v655_v47 = vcombine.high %v630_v41, %v646_v42  ;;  %v656_v57 = vcombine.low %v637_v48, %v653_v49  ;;  %v657_v58 = vcombine.high %v637_v48, %v653_v49 }
 0x322   : > { %v810_v50 = vpack.c.bf16 %v654_v46, %v654_v46  ;;  %v811_v51 = vpack.c.bf16 %v655_v47, %v655_v47  ;;  %v812_v63 = vpack.c.bf16 %v656_v57, %v656_v57  ;;  %v813_v1 = vpack.c.bf16 %v657_v58, %v657_v58 }
 0x324   : > { %v819_v55 = vsel %vm814_vm2, %v810_v50, 0  ;;  %v865_v56 = vsel %vm814_vm2, %v811_v51, 0  ;;  %v911_v6 = vsel %vm814_vm2, %v812_v63, 0  ;;  %v957_v7 = vsel %vm814_vm2, %v813_v1, 0 }
 0x325   : > { %1567 = vmatpush3.bf16.xpose.msra.mxu1 %v819_v55  ;;  %1573 = vmatpush3.bf16.xpose.msra.mxu0 %v865_v56 }
 0x326   : > { %1578 = vmatprep.subr.bf16.mxu1 %v1668_v10  ;;  %1584 = vmatprep.subr.bf16.mxu0 %v1668_v10 }
 0x32c   : > { %1569 = vmatmul.mubr.msk.bf16.vlgmr.msra.gmra.mrb[0].mxu1 %vm814_vm2, %v806_v2  ;;  %1575 = vmatmul.mubr.msk.bf16.vlgmr.msra.gmra.mrb[4].mxu0 %vm814_vm2, %v807_v3 }
 0x32d   : > { %1579 = vmatpush3.bf16.xpose.msra.mxu1 %v911_v6  ;;  %1585 = vmatpush3.bf16.xpose.msra.mxu0 %v957_v7 }
 0x32e   : > { %1580 = vmatprep.mubr.msk.bf16.mxu1 %vm1669_vm1, %v1668_v10  ;;  %1586 = vmatprep.mubr.msk.bf16.mxu0 %vm1669_vm1, %v1668_v10 }
 0x32f   : > { %1590 = vmatprep.subr.bf16.mxu1 %v1668_v10  ;;  %1596 = vmatprep.subr.bf16.mxu0 %v1668_v10 }
 0x334   : > { %1581 = vmatmul.mubr.msk.bf16.vlgmr.msra.gmra.mrb[4].mxu1 %vm814_vm2, %v808_v11  ;;  %1587 = vmatmul.mubr.msk.bf16.vlgmr.msra.gmra.mrb[8].mxu0 %vm814_vm2, %v809_v12 }
 0x335   : > { %1592 = vmatprep.mubr.msk.bf16.mxu1 %vm1669_vm1, %v1668_v10  ;;  %1598 = vmatprep.mubr.msk.bf16.mxu0 %vm1669_vm1, %v1668_v10 }
 0x3ff   : > { %v855_v13 = vpop.f32.mrb[0].mxu1  ;;  %v901_v14 = vpop.f32.mrb[4].mxu0 }
 0x400   : > { %v999_v15 = vmul.f32 0.35355338, %v855_v13  ;;  %v1000_v16 = vmul.f32 0.35355338, %v901_v14  ;;  %v1570_v17 = vpop.f32.mrb[1].mxu1  ;;  %v1576_v18 = vpop.f32.mrb[5].mxu0 }
 0x401   : > { %v858_v19 = vpop.f32.mrb[2].mxu1  ;;  %v904_v20 = vpop.f32.mrb[6].mxu0 }
 0x402   : > { %v1571_v21 = vpop.f32.mrb[3].mxu1  ;;  %v1577_v22 = vpop.f32.mrb[7].mxu0  ;;  %v1003_v23 = vsel %vm814_vm2, %v999_v15, -inf  ;;  %v1006_v24 = vsel %vm814_vm2, %v1000_v16, -inf }
 0x403   : > { %1004 = vmax.xlane.f32.xlu1 %v1003_v23  ;;  %1007 = vmax.xlane.f32.xlu0 %v1006_v24 }
 0x407   : > { %v947_v25 = vpop.f32.mrb[4].mxu1  ;;  %v993_v27 = vpop.f32.mrb[8].mxu0 }
 0x408   : > { %v1001_v28 = vmul.f32 0.35355338, %v947_v25  ;;  %v1002_v29 = vmul.f32 0.35355338, %v993_v27  ;;  %v1582_v33 = vpop.f32.mrb[5].mxu1  ;;  %v1588_v34 = vpop.f32.mrb[9].mxu0 }
 0x409   : > { %v950_v35 = vpop.f32.mrb[6].mxu1  ;;  %v996_v36 = vpop.f32.mrb[10].mxu0 }
 0x40a   : > { %v1583_v37 = vpop.f32.mrb[7].mxu1  ;;  %v1589_v38 = vpop.f32.mrb[11].mxu0  ;;  %v1009_v39 = vsel %vm814_vm2, %v1001_v28, -inf  ;;  %v1012_v40 = vsel %vm814_vm2, %v1002_v29, -inf }
 0x40b   : > { %1010 = vmax.xlane.f32.xlu1 %v1009_v39  ;;  %1013 = vmax.xlane.f32.xlu0 %v1012_v40 }
 0x41c   : > { %658 = vrot.lane.b32.xlu1 %v1774_v26, %s1676_s28 }
 0x490   : > { %v1005_v41 = vpop.xlane.xlu1 %1004  ;;  %v1008_v42 = vpop.xlane.xlu0 %1007 }
 0x491   : > { %v1015_v44 = vsub.f32 %v999_v15, %v1005_v41  ;;  %v1016_v45 = vsub.f32 %v1000_v16, %v1008_v42 }
 0x493   : > { %v1019_v46 = vmul.f32 1.442695, %v1015_v44  ;;  %v1021_v47 = vmul.f32 1.442695, %v1016_v45 }
 0x495   : > { %1644 = vpow2.f32 %v1019_v46 }
 0x496   : > { %1646 = vpow2.f32 %v1021_v47 }
 0x498   : > { %v1011_v26 = vpop.xlane.xlu1 %1010  ;;  %v1014_v54 = vpop.xlane.xlu0 %1013 }
 0x499   : > { %v1017_v52 = vsub.f32 %v1001_v28, %v1011_v26  ;;  %v1018_v55 = vsub.f32 %v1002_v29, %v1014_v54 }
 0x49b   : > { %v1023_v56 = vmul.f32 1.442695, %v1017_v52  ;;  %v1025_v57 = vmul.f32 1.442695, %v1018_v55 }
 0x49d   : > { %1648 = vpow2.f32 %v1023_v56 }
 0x49e   : > { %1650 = vpow2.f32 %v1025_v57 }
 0x49f   : > { %v1858_v48 = vpop.eup %1644 }
 0x4a0   : > { %v1860_v49 = vpop.eup %1646  ;;  %v1027_v50 = vsel %vm814_vm2, %v1858_v48, 0.0 }
 0x4a1   : > { %1028 = vadd.xlane.f32.xlu1 %v1027_v50  ;;  %v1030_v51 = vsel %vm814_vm2, %v1860_v49, 0.0 }
 0x4a2   : > { %1031 = vadd.xlane.f32.xlu0 %v1030_v51 }
 0x4a7   : > { %v1869_v58 = vpop.eup %1648 }
 0x4a8   : > { %v1871_v59 = vpop.eup %1650  ;;  %v1033_v60 = vsel %vm814_vm2, %v1869_v58, 0.0 }
 0x4b2   : > { %662 = vrot.lane.b32.xlu1 %v1783_v31, %s1676_s28  ;;  %v1036_v31 = vsel %vm814_vm2, %v1871_v59, 0.0 }
 0x4b6   : > { %664 = vrot.lane.b32.xlu1 %v1786_v32, %s1676_s28 }
 0x4b8   : > { %660 = vrot.lane.b32.xlu0 %v1780_v30, %s1676_s28  ;;  %v659_v30 = vpop.permute.xlu1 %658 }
 0x4d7   : > { %1034 = vadd.xlane.f32.xlu0 %v1033_v60 }
 0x4da   : > { %1037 = vadd.xlane.f32.xlu1 %v1036_v31 }
 0x52e   : > { %v1029_v32 = vpop.xlane.xlu1 %1028 }
 0x52f   : > { %v1032_v61 = vpop.xlane.xlu0 %1031  ;;  %1652 = vrcp.f32 %v1029_v32 }
 0x530   : > { %1654 = vrcp.f32 %v1032_v61 }
 0x532   : > { %v663_v62 = vpop.permute.xlu1 %662 }
 0x533   : > { %v670_v63 = vcombine.low %v659_v30, %v663_v62  ;;  %v671_v1 = vcombine.high %v659_v30, %v663_v62  ;;  %v661_v2 = vpop.permute.xlu0 %660 }
 0x535   : > { %v678_v6 = vrot.slane %v670_v63, %v1793_v43  ;;  %v685_v7 = vrot.slane %v671_v1, %v1793_v43 }
 0x536   : > { %v665_v3 = vpop.permute.xlu1 %664 }
 0x537   : > { %v686_v4 = vcombine.low %v661_v2, %v665_v3  ;;  %v687_v5 = vcombine.high %v661_v2, %v665_v3  ;;  %v1393_v2 = vld [vmem:[%s1963_s5] sm:$0xff] }
 0x539   : > { %v694_v8 = vrot.slane %v686_v4, %v1793_v43  ;;  %v701_v9 = vrot.slane %v687_v5, %v1793_v43  ;;  %v1653_v37 = vpop.eup %1652 }
 0x53a   : > { %v1655_v40 = vpop.eup %1654  ;;  %v1043_v46 = vmul.f32 %v1653_v37, %v1858_v48 }
 0x53b   : > { %v702_v11 = vcombine.low %v678_v6, %v694_v8  ;;  %v703_v12 = vcombine.high %v678_v6, %v694_v8  ;;  %v718_v13 = vcombine.low %v685_v7, %v701_v9  ;;  %v719_v14 = vcombine.high %v685_v7, %v701_v9 }
 0x53c   : > { %v1044_v47 = vmul.f32 %v1655_v40, %v1860_v49  ;;  %v1047_v56 = vpack.c.bf16 %v1043_v46, %v1043_v46 }
 0x53d   : > { %v710_v15 = vrot.slane %v702_v11, %v1803_v53  ;;  %v717_v16 = vrot.slane %v703_v12, %v1803_v53  ;;  %v726_v17 = vrot.slane %v718_v13, %v1803_v53  ;;  %v733_v18 = vrot.slane %v719_v14, %v1803_v53 }
 0x53e   : > { %v1048_v57 = vpack.c.bf16 %v1044_v47, %v1044_v47 }
 0x53f   : > { %v738_v19 = vcombine.low %v710_v15, %v717_v16  ;;  %v1520_v20 = vcombine.high %v710_v15, %v717_v16  ;;  %v754_v21 = vcombine.low %v726_v17, %v733_v18  ;;  %v1521_v22 = vcombine.high %v726_v17, %v733_v18 }
 0x541   : > { %v745_v23 = vrot.slane %v738_v19, %v1793_v43  ;;  %v753_v24 = vrot.slane %v1520_v20, %v1793_v43  ;;  %v761_v25 = vrot.slane %v754_v21, %v1793_v43  ;;  %v769_v27 = vrot.slane %v1521_v22, %v1793_v43 }
 0x543   : > { %v770_v28 = vcombine.low %v745_v23, %v753_v24  ;;  %v771_v29 = vcombine.high %v745_v23, %v753_v24  ;;  %v786_v33 = vcombine.low %v761_v25, %v769_v27  ;;  %v787_v34 = vcombine.high %v761_v25, %v769_v27 }
 0x545   : > { %v778_v35 = vrot.slane %v770_v28, %v1803_v53  ;;  %v785_v36 = vrot.slane %v771_v29, %v1803_v53  ;;  %v794_v38 = vrot.slane %v786_v33, %v1803_v53  ;;  %v801_v39 = vrot.slane %v787_v34, %v1803_v53 }
 0x547   : > { %v802_v41 = vcombine.low %v778_v35, %v794_v38  ;;  %v803_v42 = vcombine.high %v778_v35, %v794_v38  ;;  %v804_v44 = vcombine.low %v785_v36, %v801_v39  ;;  %v805_v45 = vcombine.high %v785_v36, %v801_v39  ;;  %v1395_v35 = vld [vmem:[%s1963_s5 + $0x10] sm:$0xff]  ;;  %v1396_v36 = vld [vmem:[%s1963_s5 + $0x18] sm:$0xff] }
 0x549   : > { %v1051_v50 = vpack.c.bf16 %v802_v41, %v802_v41  ;;  %v1052_v51 = vpack.c.bf16 %v803_v42, %v803_v42  ;;  %v1053_v54 = vpack.c.bf16 %v804_v44, %v804_v44  ;;  %v1054_v55 = vpack.c.bf16 %v805_v45, %v805_v45 }
 0x54a   : > { %v1399_v41 = vpack.c.bf16 %v1396_v36, %v1395_v35 }
 0x54b   : > { %v1060_v26 = vsel %vm1058_vm3, %v1051_v50, 0  ;;  %v1106_v52 = vsel %vm1058_vm3, %v1052_v51, 0  ;;  %v1152_v48 = vsel %vm1058_vm3, %v1053_v54, 0  ;;  %v1198_v49 = vsel %vm1058_vm3, %v1054_v55, 0 }
 0x54c   : > { %1591 = vmatpush3.bf16.msra.mxu1 %v1060_v26  ;;  %1597 = vmatpush3.bf16.msra.mxu0 %v1106_v52 }
 0x54d   : > { %1602 = vmatprep.subr.bf16.mxu1 %v1668_v10  ;;  %1608 = vmatprep.subr.bf16.mxu0 %v1668_v10 }
 0x54f   : > { %1593 = vmatmul.mubr.msk.bf16.vlgmr.msra.gmra.mrb[8].mxu1 %vm814_vm2, %v1047_v56  ;;  %1599 = vmatmul.mubr.msk.bf16.vlgmr.msra.gmra.mrb[12].mxu0 %vm814_vm2, %v1048_v57 }
 0x550   : > { %1603 = vmatpush3.bf16.msra.mxu1 %v1152_v48  ;;  %1609 = vmatpush3.bf16.msra.mxu0 %v1198_v49 }
 0x551   : > { %1604 = vmatprep.mubr.msk.bf16.mxu1 %vm1669_vm1, %v1668_v10  ;;  %1610 = vmatprep.mubr.msk.bf16.mxu0 %vm1669_vm1, %v1668_v10 }
 0x552   : > { %1614 = vmatprep.subr.bf16.mxu1 %v1668_v10 }
 0x564   : > { %v1035_v60 = vpop.xlane.xlu0 %1034 }
 0x565   : > { %1656 = vrcp.f32 %v1035_v60 }
 0x567   : > { %v1038_v31 = vpop.xlane.xlu1 %1037 }
 0x568   : > { %1658 = vrcp.f32 %v1038_v31 }
 0x56f   : > { %v1657_v30 = vpop.eup %1656 }
 0x570   : > { %v1045_v32 = vmul.f32 %v1657_v30, %v1869_v58  ;;  %v1394_v58 = vld [vmem:[%s1963_s5 + $0x8] sm:$0xff] }
 0x571   : > { %v1398_v3 = vpack.c.bf16 %v1394_v58, %v1393_v2 }
 0x572   : > { %v1659_v61 = vpop.eup %1658  ;;  %v1049_v62 = vpack.c.bf16 %v1045_v32, %v1045_v32 }
 0x573   : > { %v1046_v63 = vmul.f32 %v1659_v61, %v1871_v59 }
 0x574   : > { %1605 = vmatmul.mubr.msk.bf16.vlgmr.msra.gmra.mrb[12].mxu1 %vm814_vm2, %v1049_v62 }
 0x575   : > { %v1050_v1 = vpack.c.bf16 %v1046_v63, %v1046_v63  ;;  %1618 = vmatprep.mubr.msk.bf16.mxu1 %vm1669_vm1, %v1668_v10  ;;  %1615 = vmatpush3.bf16.msra.mxu1 %v1398_v3  ;;  %v1532_v3 = vld [vmem:[%s1964_s6] ss:$0 sm:$0xff] }
 0x576   : > { %1616 = vmatprep.subr.bf16.mxu1 %v1668_v10 }
 0x577   : > { %1611 = vmatmul.mubr.msk.bf16.vlgmr.msra.gmra.mrb[16].mxu0 %vm814_vm2, %v1050_v1 }
 0x579   : > { %1617 = vmatpush3.bf16.msra.mxu1 %v1399_v41 }
 0x622   : > { %v1096_v59 = vpop.f32.mrb[8].mxu1  ;;  %v1142_v4 = vpop.f32.mrb[12].mxu0 }
 0x623   : > { %v1594_v5 = vpop.f32.mrb[9].mxu1  ;;  %v1600_v6 = vpop.f32.mrb[13].mxu0 }
 0x624   : > { %v1099_v7 = vpop.f32.mrb[10].mxu1  ;;  %v1145_v8 = vpop.f32.mrb[14].mxu0 }
 0x625   : > { %v1595_v9 = vpop.f32.mrb[11].mxu1  ;;  %v1601_v11 = vpop.f32.mrb[15].mxu0 }
 0x647   : > { %v1188_v12 = vpop.f32.mrb[12].mxu1 }
 0x648   : > { %v1240_v13 = vcombine.low %v1096_v59, %v1188_v12  ;;  %v1241_v14 = vcombine.high %v1096_v59, %v1188_v12  ;;  %v1606_v15 = vpop.f32.mrb[13].mxu1 }
 0x649   : > { %v1191_v16 = vpop.f32.mrb[14].mxu1 }
 0x64a   : > { %v1607_v17 = vpop.f32.mrb[15].mxu1  ;;  %v1234_v18 = vpop.f32.mrb[16].mxu0  ;;  %v1248_v10 = vrot.slane %v1240_v13, %v1793_v43  ;;  %v1255_v23 = vrot.slane %v1241_v14, %v1793_v43 }
 0x64b   : > { %v1256_v19 = vcombine.low %v1142_v4, %v1234_v18  ;;  %v1257_v20 = vcombine.high %v1142_v4, %v1234_v18  ;;  %v1612_v21 = vpop.f32.mrb[17].mxu0 }
 0x64c   : > { %v1237_v22 = vpop.f32.mrb[18].mxu0 }
 0x64d   : > { %v1264_v24 = vrot.slane %v1256_v19, %v1793_v43  ;;  %v1271_v25 = vrot.slane %v1257_v20, %v1793_v43  ;;  %v1613_v27 = vpop.f32.mrb[19].mxu0 }
 0x64f   : > { %v1272_v28 = vcombine.low %v1248_v10, %v1264_v24  ;;  %v1273_v29 = vcombine.high %v1248_v10, %v1264_v24  ;;  %v1288_v33 = vcombine.low %v1255_v23, %v1271_v25  ;;  %v1289_v34 = vcombine.high %v1255_v23, %v1271_v25 }
 0x651   : > { %v1280_v37 = vrot.slane %v1272_v28, %v1803_v53  ;;  %v1287_v38 = vrot.slane %v1273_v29, %v1803_v53  ;;  %v1296_v39 = vrot.slane %v1288_v33, %v1803_v53  ;;  %v1303_v40 = vrot.slane %v1289_v34, %v1803_v53 }
 0x653   : > { %v1308_v42 = vcombine.low %v1280_v37, %v1287_v38  ;;  %v1530_v44 = vcombine.high %v1280_v37, %v1287_v38  ;;  %v1324_v45 = vcombine.low %v1296_v39, %v1303_v40  ;;  %v1531_v46 = vcombine.high %v1296_v39, %v1303_v40 }
 0x655   : > { %v1315_v47 = vrot.slane %v1308_v42, %v1793_v43  ;;  %v1323_v50 = vrot.slane %v1530_v44, %v1793_v43  ;;  %v1331_v51 = vrot.slane %v1324_v45, %v1793_v43  ;;  %v1339_v26 = vrot.slane %v1531_v46, %v1793_v43 }
 0x657   : > { %v1341_v52 = vcombine.high %v1315_v47, %v1323_v50  ;;  %v1357_v54 = vcombine.high %v1331_v51, %v1339_v26  ;;  %v1340_v55 = vcombine.low %v1315_v47, %v1323_v50  ;;  %v1356_v56 = vcombine.low %v1331_v51, %v1339_v26 }
 0x659   : > { %v1355_v57 = vrot.slane %v1341_v52, %v1803_v53  ;;  %v1371_v48 = vrot.slane %v1357_v54, %v1803_v53  ;;  %v1348_v49 = vrot.slane %v1340_v55, %v1803_v53  ;;  %v1364_v60 = vrot.slane %v1356_v56, %v1803_v53 }
 0x65b   : > { %v1374_v31 = vcombine.low %v1355_v57, %v1371_v48  ;;  %v1373_v30 = vcombine.high %v1348_v49, %v1364_v60  ;;  %v1375_v32 = vcombine.high %v1355_v57, %v1371_v48  ;;  %v1372_v61 = vcombine.low %v1348_v49, %v1364_v60 }
 0x65d   : > { %1381 = vrot.lane.b32.xlu1 %v1374_v31, %s1677_s14  ;;  %1377 = vrot.lane.b32.xlu0 %v1373_v30, %s1678_s15 }
 0x661   : > { %1385 = vrot.lane.b32.xlu0 %v1375_v32, %s1679_s16 }
 0x6cf   : > { %v1378_v43 = vpop.permute.xlu0 %1377  ;;  %v1382_v62 = vpop.permute.xlu1 %1381 }
 0x6d0   : > { %v1388_v63 = vsel %vm814_vm2, %v1372_v61, %v1378_v43 }
 0x6d1   : > { %v1390_v2 = vsel %vm1389_vm4, %v1388_v63, %v1382_v62 }
 0x6d3   : > { %v1386_v1 = vpop.permute.xlu0 %1385 }
 0x6d4   : > { %v1392_v53 = vsel %vm1391_vm5, %v1390_v2, %v1386_v1 }
 0x6d5   : > { %v1397_v58 = vpack.c.bf16 %v1392_v53, %v1392_v53 }
 0x6d7   : > { %1619 = vmatmul.mubr.msk.bf16.vlgmr.msra.gmra.mrb[16].mxu1 %vm278_vm0, %v1397_v58 }
 0x7aa   : > { %v1444_v59 = vpop.f32.mrb[16].mxu1 }
 0x7ab   : > { %v1445_v4 = vadd.f32 %v1532_v3, %v1444_v59  ;;  %v1620_v5 = vpop.f32.mrb[17].mxu1 }
 0x7ac   : > { %v1447_v6 = vpop.f32.mrb[18].mxu1 }
 0x7ad   : > { %v1450_v7 = vadd.f32 %v1445_v4, %v1736_v0  ;;  %v1621_v8 = vpop.f32.mrb[19].mxu1 }
 0x7af   : > { %1451 = vst.msk [vmem:[%s273_s21] sm:$0xff] %vm278_vm0, %v1450_v7 }
 0x7b0 PF: > { %s17_s24 = sadd.s32 1, %s1666_s24  }
 0x7b1   : > { %p14_p4 = scmp.ge.s32.totalorder %s17_s24, 4  }
 0x7b3   :  { %16 = sbr.rel (!%p14_p4) target bundleno = 1 (0x1), region = 78 }

// kernel: text_embedding_forward.11
= control target key start
LH: loop header
LB: loop body
LE: loop exit
PB: predicated region body
PF: predicated region fallthrough
CT: control target
= control target key end

     0   :  { %vm19_vm0 = vcmask 261120   ;;  %s167_s0 = inlined_call_operand.vmem [shape: f32[16,32], index: 0, kind: input, shape index: {}]   ;;  %s168_s1 = inlined_call_operand.vmem [shape: f32[1,32], index: 1, kind: input, shape index: {}]   ;;  %s169_s2 = inlined_call_operand.vmem [shape: f32[1,32], index: 2, kind: input, shape index: {}]   ;;  %s170_s3 = inlined_call_operand.hbm [shape: f32[16,32], index: 3, kind: output, shape index: {}]  }
   0x1   :  { %v15_v0 = vld [vmem:[%s167_s0] sm:$0xff]  ;;  %v16_v1 = vld [vmem:[%s167_s0 + $0x8] sm:$0xff] }
   0x2   :  { %8 = vsyncpa [#allocation3], 0  ;;  %v20_v2 = vsel %vm19_vm0, %v15_v0, 0.0  ;;  %v23_v3 = vsel %vm19_vm0, %v16_v1, 0.0  ;;  %v81_v21 = vld [vmem:[%s168_s1] ss:$0 sm:$0xff] }
   0x3   :  { %21 = vadd.xlane.f32.xlu0 %v20_v2  ;;  %v82_v23 = vld [vmem:[%s169_s2] ss:$0 sm:$0xff]  ;;  %s114_s19 = smov [#allocation2]  }
   0x4   :  { %s70_s20 = sshll.u32 %s114_s19, 4  ;;  %s71_s20 = int_to_ptr.vmem [resolvable:$true] %s70_s20 }
   0x5   :  { %s90_s21 = scalar_lea.vmem %s71_s20, 256  ;;  %p95_p1 = scmp.lt.s32.totalorder %s71_s20, %s71_s20 }
   0x6   :  { %p91_p0 = scmp.ne.s32.totalorder %s71_s20, %s90_s21  ;;  %p96_p2 = scmp.lt.s32.totalorder %s90_s21, %s90_s21 }
   0x7   :  { %24 = vadd.xlane.f32.xlu0 %v23_v3 }
   0x8   :  { %p97_p3 = por %p96_p2, %p95_p1 }
   0xa   :  { %p98_p4 = pnand %p97_p3, %p91_p0 }
  0x90   :  { %v22_v4 = vpop.xlane.xlu0 %21 }
  0x91   :  { %v27_v5 = vmul.f32 0.03125, %v22_v4 }
  0x93   :  { %v29_v6 = vsub.f32 %v15_v0, %v27_v5 }
  0x94   :  { %v25_v7 = vpop.xlane.xlu0 %24 }
  0x95   :  { %v28_v8 = vmul.f32 0.03125, %v25_v7  ;;  %v31_v9 = vmul.f32 %v29_v6, %v29_v6 }
  0x97   :  { %v30_v10 = vsub.f32 %v16_v1, %v28_v8  ;;  %v33_v11 = vsel %vm19_vm0, %v31_v9, 0.0 }
  0x98   :  { %34 = vadd.xlane.f32.xlu1 %v33_v11 }
  0x99   :  { %v32_v12 = vmul.f32 %v30_v10, %v30_v10 }
  0x9b   :  { %v36_v13 = vsel %vm19_vm0, %v32_v12, 0.0 }
  0x9c   :  { %37 = vadd.xlane.f32.xlu1 %v36_v13 }
 0x125   :  { %v35_v14 = vpop.xlane.xlu1 %34 }
 0x126   :  { %v39_v15 = vmul.f32 0.03125, %v35_v14 }
 0x128   :  { %v41_v16 = vadd.f32 1e-05, %v39_v15 }
 0x129   :  { %v38_v17 = vpop.xlane.xlu1 %37 }
 0x12a   :  { %86 = vrsqrt.f32 %v41_v16  ;;  %v40_v18 = vmul.f32 0.03125, %v38_v17 }
 0x12c   :  { %v42_v19 = vadd.f32 1e-05, %v40_v18 }
 0x12e   :  { %88 = vrsqrt.f32 %v42_v19 }
 0x134   :  { %v87_v20 = vpop.eup %86 }
 0x135   :  { %v45_v22 = vmul.f32 %v87_v20, %v29_v6 }
 0x137   :  { %v53_v24 = vmul.f32 %v81_v21, %v45_v22 }
 0x138   :  { %v89_v25 = vpop.eup %88 }
 0x139   :  { %v46_v26 = vmul.f32 %v89_v25, %v30_v10  ;;  %v61_v27 = vadd.f32 %v82_v23, %v53_v24 }
 0x13b   :  { %v54_v28 = vmul.f32 %v81_v21, %v46_v26  ;;  %63 = vst.msk [vmem:[#allocation2] sm:$0xff] %vm19_vm0, %v61_v27 }
 0x13d   :  { %v62_v29 = vadd.f32 %v82_v23, %v54_v28 }
 0x13f   :  { %64 = vst.msk [vmem:[#allocation2 + $0x8] sm:$0xff] %vm19_vm0, %v62_v29 }
 0x140   :  { %101 = shalt.err (!%p98_p4)
}
 0x141   :  { %s102_s22 = scalar_lea.hbm %s170_s3, 256 }
 0x142   :  { %p103_p5 = scmp.ne.s32.totalorder %s170_s3, %s102_s22  ;;  %p106_p6 = scmp.lt.u32.totalorder %s102_s22, %s170_s3 }
 0x144   :  { %p108_p7 = pnand %p106_p6, %p103_p5 }
 0x146   :  { %111 = shalt.err (!%p108_p7)
}
 0x147   :  { %s115_s27 = smov 128   ;;  %s116_s28 = smov 8  }
 0x148   :  { %76 = dma.vmem_to_hbm [thread:$0]  %s71_s20, 256, %s170_s3, [#allocation3], %s115_s27, %s115_s27, %s116_s28  }
 0x149   :  { %112 = dma.done.wait [#allocation3], 256  }
 0x14a   :  { %113 = vsyncadd [#allocation3], 4294967040 }
 0x14b   :  { %80 = vsyncpa [#allocation3], 1 }

</bundles_post_ra>
